<compile_context>
chip_gen: v7x
topology: tpu7x:2x2x1
jax: 0.10.0
libtpu: 0.0.40
codegen_flags: <defaults>
</compile_context>

<pallas_src>
import functools

import numpy as np
import jax
import jax.numpy as jnp
from jax import lax
from jax.experimental import pallas as pl
from jax.experimental.pallas import tpu as pltpu


def _conv1x1_tanh_maxpool_kernel(x_ref, w_ref, b_ref, o_ref, hm_ref, *, OH, OW, K, S):
    # x_ref: (bt, H, W, Cin)   w_ref: (Cin, Cout)   b_ref: (1, Cout)
    # o_ref: (bt, OH, OW, Cout)   hm_ref (scratch): (bt, OH, W, Cout) f32
    bt, H, W, Cin = x_ref.shape
    Cout = w_ref.shape[1]

    x = x_ref[...].astype(jnp.float32)              # (bt, H, W, Cin)
    w = w_ref[...].astype(jnp.float32)              # (Cin, Cout)
    bias = b_ref[...].astype(jnp.float32)           # (1, Cout)

    # ---- 1x1 conv on the MXU (otherwise idle slot): flatten batch+spatial onto
    # the sublane axis (W is a multiple of 8, so the reshape is tile-aligned).
    x2 = x.reshape(bt * H * W, Cin)
    y2 = jnp.dot(x2, w, preferred_element_type=jnp.float32) + bias
    y = jnp.tanh(y2).reshape(bt, H, W, Cout)        # (bt, H, W, Cout) f32

    # ---- MaxPool2d(K, stride=S, padding=0), separable: H first, then W.
    # H is a major (non-minor) axis: each output row is K-1 whole-slab VPU maxima;
    # accumulate into the VMEM scratch (no concatenation, no strided slices).
    for oh in range(OH):
        h0 = oh * S
        acc = y[:, h0:h0 + 1]                       # (bt, 1, W, Cout)
        for r in range(1, K):
            acc = jnp.maximum(acc, y[:, h0 + r:h0 + r + 1])
        hm_ref[:, oh:oh + 1] = acc

    # W is the sublane axis.  Roll-and-max: after K-1 rolls the running max at
    # sublane w holds max(hm[w : w+K]); valid window starts never read wrapped rows.
    hm = hm_ref[...]                                # (bt, OH, W, Cout)
    wmax = hm
    for r in range(1, K):
        wmax = jnp.maximum(wmax, pltpu.roll(hm, W - r, axis=2))

    # Select the OW window starts (stride S) directly into the output ref.
    for ow in range(OW):
        w0 = ow * S
        o_ref[:, :, ow:ow + 1, :] = wmax[:, :, w0:w0 + 1, :].astype(o_ref.dtype)


def _pick_batch_tile(n, cap=8):
    """Largest divisor of n that is <= cap (single fat grid step when N is small)."""
    for bt in range(min(cap, n), 0, -1):
        if n % bt == 0:
            return bt
    return 1


def model_tanh_forward(x_nchw, w, b, *, pool_k=7, pool_s=3, batch_tile=None):
    """x_nchw: (N, Cin, H, W); w: (Cin, Cout); b: (Cout,). Returns (N, Cout, OH, OW)."""
    N, Cin, H, W = x_nchw.shape
    Cout = w.shape[1]
    OH = (H - pool_k) // pool_s + 1
    OW = (W - pool_k) // pool_s + 1

    if batch_tile is None:
        batch_tile = _pick_batch_tile(N)
    assert N % batch_tile == 0, "batch_tile must divide N"
    grid = (N // batch_tile,)

    # Glue: NCHW -> NHWC (single XLA transpose outside the kernel).
    x_nhwc = jnp.transpose(x_nchw, (0, 2, 3, 1))            # (N, H, W, Cin)
    b2 = b.reshape(1, Cout)

    kernel = functools.partial(
        _conv1x1_tanh_maxpool_kernel, OH=OH, OW=OW, K=pool_k, S=pool_s
    )

    out_nhwc = pl.pallas_call(
        kernel,
        out_shape=jax.ShapeDtypeStruct((N, OH, OW, Cout), x_nchw.dtype),
        grid=grid,
        in_specs=[
            pl.BlockSpec((batch_tile, H, W, Cin), lambda n: (n, 0, 0, 0)),
            # w / b have constant index maps -> stay resident across grid steps.
            pl.BlockSpec((Cin, Cout), lambda n: (0, 0)),
            pl.BlockSpec((1, Cout), lambda n: (0, 0)),
        ],
        out_specs=pl.BlockSpec((batch_tile, OH, OW, Cout), lambda n: (n, 0, 0, 0)),
        scratch_shapes=[pltpu.VMEM((batch_tile, OH, W, Cout), jnp.float32)],
        compiler_params=pltpu.CompilerParams(dimension_semantics=("parallel",)),
    )(x_nhwc, w, b2)

    return jnp.transpose(out_nhwc, (0, 3, 1, 2))            # back to NCHW


def _reference(x_nchw, w, b, *, pool_k=7, pool_s=3):
    y = jnp.einsum("nchw,cd->ndhw", x_nchw, w) + b[None, :, None, None]
    y = jnp.tanh(y)
    return lax.reduce_window(
        y, -jnp.inf, lax.max,
        (1, 1, pool_k, pool_k), (1, 1, pool_s, pool_s), "VALID",
    )


if __name__ == "__main__":
    key = jax.random.PRNGKey(0)
    kx, kw, kb = jax.random.split(key, 3)

    # Small shapes consistent with the module (Conv2d(3, 12, 1) then MaxPool2d(7, 3)).
    N, Cin, H, W = 2, 3, 16, 16
    Cout = 12

    x = jax.random.normal(kx, (N, Cin, H, W), dtype=jnp.float32)
    # PyTorch Conv2d weight is (Cout, Cin, 1, 1); stored here pre-transposed as
    # (Cin, Cout) for the in-kernel matmul.
    w = jax.random.normal(kw, (Cin, Cout), dtype=jnp.float32) * 0.1
    b = jax.random.normal(kb, (Cout,), dtype=jnp.float32) * 0.1

    out = model_tanh_forward(x, w, b)
    out = jax.block_until_ready(out)

    ref = _reference(x, w, b)
    np.testing.assert_allclose(np.asarray(out), np.asarray(ref), rtol=1e-5, atol=1e-5)
    assert out.shape == (N, Cout, (H - 7) // 3 + 1, (W - 7) // 3 + 1)

    print("KERNEL_OK")
</pallas_src>

<mosaic_0001>
module attributes {stable_mosaic.version = 11 : i64} {
  func.func @_conv1x1_tanh_maxpool_kernel(%arg0: i32, %arg1: memref<2x16x16x3xf32, #tpu.memory_space<vmem>>, %arg2: memref<3x12xf32, #tpu.memory_space<vmem>>, %arg3: memref<1x12xf32, #tpu.memory_space<vmem>>, %arg4: memref<2x4x4x12xf32, #tpu.memory_space<vmem>>, %arg5: memref<2x4x16x12xf32, #tpu.memory_space<vmem>>) attributes {dimension_semantics = [#tpu.dimension_semantics<parallel>], iteration_bounds = array<i64: 1>, scalar_prefetch = 0 : i64, scratch_operands = 1 : i64, tpu.core_type = #tpu.core_type<tc>, window_params = [{transform_indices = @transform_0, window_bounds = array<i64: 2, 16, 16, 3>}, {pipeline_mode = #tpu.pipeline_mode<synchronous>, transform_indices = @transform_1, window_bounds = array<i64: 3, 12>}, {pipeline_mode = #tpu.pipeline_mode<synchronous>, transform_indices = @transform_2, window_bounds = array<i64: 1, 12>}, {transform_indices = @transform_3, window_bounds = array<i64: 2, 4, 4, 12>}]} {
    %c0 = arith.constant 0 : index
    %c0_0 = arith.constant 0 : index
    %c0_1 = arith.constant 0 : index
    %c0_2 = arith.constant 0 : index
    %0 = vector.load %arg1[%c0, %c0_0, %c0_1, %c0_2] : memref<2x16x16x3xf32, #tpu.memory_space<vmem>>, vector<2x16x16x3xf32>
    %c0_3 = arith.constant 0 : index
    %c0_4 = arith.constant 0 : index
    %1 = vector.load %arg2[%c0_3, %c0_4] : memref<3x12xf32, #tpu.memory_space<vmem>>, vector<3x12xf32>
    %c0_5 = arith.constant 0 : index
    %c0_6 = arith.constant 0 : index
    %2 = vector.load %arg3[%c0_5, %c0_6] : memref<1x12xf32, #tpu.memory_space<vmem>>, vector<1x12xf32>
    %3 = vector.shape_cast %0 : vector<2x16x16x3xf32> to vector<512x3xf32>
    %cst = arith.constant dense<0.000000e+00> : vector<512x12xf32>
    %4 = tpu.matmul %3, %1, %cst {dimension_numbers = #tpu.dot_dimension_numbers<[1], [0], [0], [1], [0, 0, 1, 1], [], []>} : vector<512x3xf32>, vector<3x12xf32>, vector<512x12xf32> -> vector<512x12xf32>
    %5 = vector.broadcast %2 : vector<1x12xf32> to vector<512x12xf32>
    %6 = arith.addf %4, %5 : vector<512x12xf32>
    %7 = math.tanh %6 : vector<512x12xf32>
    %8 = vector.shape_cast %7 : vector<512x12xf32> to vector<2x16x16x12xf32>
    %9 = vector.extract_strided_slice %8 {offsets = [0, 0, 0, 0], sizes = [2, 1, 16, 12], strides = [1, 1, 1, 1]} : vector<2x16x16x12xf32> to vector<2x1x16x12xf32>
    %10 = vector.extract_strided_slice %8 {offsets = [0, 1, 0, 0], sizes = [2, 1, 16, 12], strides = [1, 1, 1, 1]} : vector<2x16x16x12xf32> to vector<2x1x16x12xf32>
    %11 = arith.maximumf %9, %10 : vector<2x1x16x12xf32>
    %12 = vector.extract_strided_slice %8 {offsets = [0, 2, 0, 0], sizes = [2, 1, 16, 12], strides = [1, 1, 1, 1]} : vector<2x16x16x12xf32> to vector<2x1x16x12xf32>
    %13 = arith.maximumf %11, %12 : vector<2x1x16x12xf32>
    %14 = vector.extract_strided_slice %8 {offsets = [0, 3, 0, 0], sizes = [2, 1, 16, 12], strides = [1, 1, 1, 1]} : vector<2x16x16x12xf32> to vector<2x1x16x12xf32>
    %15 = arith.maximumf %13, %14 : vector<2x1x16x12xf32>
    %16 = vector.extract_strided_slice %8 {offsets = [0, 4, 0, 0], sizes = [2, 1, 16, 12], strides = [1, 1, 1, 1]} : vector<2x16x16x12xf32> to vector<2x1x16x12xf32>
    %17 = arith.maximumf %15, %16 : vector<2x1x16x12xf32>
    %18 = vector.extract_strided_slice %8 {offsets = [0, 5, 0, 0], sizes = [2, 1, 16, 12], strides = [1, 1, 1, 1]} : vector<2x16x16x12xf32> to vector<2x1x16x12xf32>
    %19 = arith.maximumf %17, %18 : vector<2x1x16x12xf32>
    %20 = vector.extract_strided_slice %8 {offsets = [0, 6, 0, 0], sizes = [2, 1, 16, 12], strides = [1, 1, 1, 1]} : vector<2x16x16x12xf32> to vector<2x1x16x12xf32>
    %21 = arith.maximumf %19, %20 : vector<2x1x16x12xf32>
    %c0_7 = arith.constant 0 : index
    %c0_8 = arith.constant 0 : index
    %c0_9 = arith.constant 0 : index
    %c0_10 = arith.constant 0 : index
    %22 = vector.load %arg5[%c0_7, %c0_8, %c0_9, %c0_10] : memref<2x4x16x12xf32, #tpu.memory_space<vmem>>, vector<2x1x16x12xf32>
    tpu.vector_store %arg5[%c0_7, %c0_8, %c0_9, %c0_10], %21 {strides = array<i32>} : memref<2x4x16x12xf32, #tpu.memory_space<vmem>>, vector<2x1x16x12xf32>,
    %23 = vector.extract_strided_slice %8 {offsets = [0, 3, 0, 0], sizes = [2, 1, 16, 12], strides = [1, 1, 1, 1]} : vector<2x16x16x12xf32> to vector<2x1x16x12xf32>
    %24 = vector.extract_strided_slice %8 {offsets = [0, 4, 0, 0], sizes = [2, 1, 16, 12], strides = [1, 1, 1, 1]} : vector<2x16x16x12xf32> to vector<2x1x16x12xf32>
    %25 = arith.maximumf %23, %24 : vector<2x1x16x12xf32>
    %26 = vector.extract_strided_slice %8 {offsets = [0, 5, 0, 0], sizes = [2, 1, 16, 12], strides = [1, 1, 1, 1]} : vector<2x16x16x12xf32> to vector<2x1x16x12xf32>
    %27 = arith.maximumf %25, %26 : vector<2x1x16x12xf32>
    %28 = vector.extract_strided_slice %8 {offsets = [0, 6, 0, 0], sizes = [2, 1, 16, 12], strides = [1, 1, 1, 1]} : vector<2x16x16x12xf32> to vector<2x1x16x12xf32>
    %29 = arith.maximumf %27, %28 : vector<2x1x16x12xf32>
    %30 = vector.extract_strided_slice %8 {offsets = [0, 7, 0, 0], sizes = [2, 1, 16, 12], strides = [1, 1, 1, 1]} : vector<2x16x16x12xf32> to vector<2x1x16x12xf32>
    %31 = arith.maximumf %29, %30 : vector<2x1x16x12xf32>
    %32 = vector.extract_strided_slice %8 {offsets = [0, 8, 0, 0], sizes = [2, 1, 16, 12], strides = [1, 1, 1, 1]} : vector<2x16x16x12xf32> to vector<2x1x16x12xf32>
    %33 = arith.maximumf %31, %32 : vector<2x1x16x12xf32>
    %34 = vector.extract_strided_slice %8 {offsets = [0, 9, 0, 0], sizes = [2, 1, 16, 12], strides = [1, 1, 1, 1]} : vector<2x16x16x12xf32> to vector<2x1x16x12xf32>
    %35 = arith.maximumf %33, %34 : vector<2x1x16x12xf32>
    %c0_11 = arith.constant 0 : index
    %c1 = arith.constant 1 : index
    %c0_12 = arith.constant 0 : index
    %c0_13 = arith.constant 0 : index
    %36 = vector.load %arg5[%c0_11, %c1, %c0_12, %c0_13] : memref<2x4x16x12xf32, #tpu.memory_space<vmem>>, vector<2x1x16x12xf32>
    tpu.vector_store %arg5[%c0_11, %c1, %c0_12, %c0_13], %35 {strides = array<i32>} : memref<2x4x16x12xf32, #tpu.memory_space<vmem>>, vector<2x1x16x12xf32>,
    %37 = vector.extract_strided_slice %8 {offsets = [0, 6, 0, 0], sizes = [2, 1, 16, 12], strides = [1, 1, 1, 1]} : vector<2x16x16x12xf32> to vector<2x1x16x12xf32>
    %38 = vector.extract_strided_slice %8 {offsets = [0, 7, 0, 0], sizes = [2, 1, 16, 12], strides = [1, 1, 1, 1]} : vector<2x16x16x12xf32> to vector<2x1x16x12xf32>
    %39 = arith.maximumf %37, %38 : vector<2x1x16x12xf32>
    %40 = vector.extract_strided_slice %8 {offsets = [0, 8, 0, 0], sizes = [2, 1, 16, 12], strides = [1, 1, 1, 1]} : vector<2x16x16x12xf32> to vector<2x1x16x12xf32>
    %41 = arith.maximumf %39, %40 : vector<2x1x16x12xf32>
    %42 = vector.extract_strided_slice %8 {offsets = [0, 9, 0, 0], sizes = [2, 1, 16, 12], strides = [1, 1, 1, 1]} : vector<2x16x16x12xf32> to vector<2x1x16x12xf32>
    %43 = arith.maximumf %41, %42 : vector<2x1x16x12xf32>
    %44 = vector.extract_strided_slice %8 {offsets = [0, 10, 0, 0], sizes = [2, 1, 16, 12], strides = [1, 1, 1, 1]} : vector<2x16x16x12xf32> to vector<2x1x16x12xf32>
    %45 = arith.maximumf %43, %44 : vector<2x1x16x12xf32>
    %46 = vector.extract_strided_slice %8 {offsets = [0, 11, 0, 0], sizes = [2, 1, 16, 12], strides = [1, 1, 1, 1]} : vector<2x16x16x12xf32> to vector<2x1x16x12xf32>
    %47 = arith.maximumf %45, %46 : vector<2x1x16x12xf32>
    %48 = vector.extract_strided_slice %8 {offsets = [0, 12, 0, 0], sizes = [2, 1, 16, 12], strides = [1, 1, 1, 1]} : vector<2x16x16x12xf32> to vector<2x1x16x12xf32>
    %49 = arith.maximumf %47, %48 : vector<2x1x16x12xf32>
    %c0_14 = arith.constant 0 : index
    %c2 = arith.constant 2 : index
    %c0_15 = arith.constant 0 : index
    %c0_16 = arith.constant 0 : index
    %50 = vector.load %arg5[%c0_14, %c2, %c0_15, %c0_16] : memref<2x4x16x12xf32, #tpu.memory_space<vmem>>, vector<2x1x16x12xf32>
    tpu.vector_store %arg5[%c0_14, %c2, %c0_15, %c0_16], %49 {strides = array<i32>} : memref<2x4x16x12xf32, #tpu.memory_space<vmem>>, vector<2x1x16x12xf32>,
    %51 = vector.extract_strided_slice %8 {offsets = [0, 9, 0, 0], sizes = [2, 1, 16, 12], strides = [1, 1, 1, 1]} : vector<2x16x16x12xf32> to vector<2x1x16x12xf32>
    %52 = vector.extract_strided_slice %8 {offsets = [0, 10, 0, 0], sizes = [2, 1, 16, 12], strides = [1, 1, 1, 1]} : vector<2x16x16x12xf32> to vector<2x1x16x12xf32>
    %53 = arith.maximumf %51, %52 : vector<2x1x16x12xf32>
    %54 = vector.extract_strided_slice %8 {offsets = [0, 11, 0, 0], sizes = [2, 1, 16, 12], strides = [1, 1, 1, 1]} : vector<2x16x16x12xf32> to vector<2x1x16x12xf32>
    %55 = arith.maximumf %53, %54 : vector<2x1x16x12xf32>
    %56 = vector.extract_strided_slice %8 {offsets = [0, 12, 0, 0], sizes = [2, 1, 16, 12], strides = [1, 1, 1, 1]} : vector<2x16x16x12xf32> to vector<2x1x16x12xf32>
    %57 = arith.maximumf %55, %56 : vector<2x1x16x12xf32>
    %58 = vector.extract_strided_slice %8 {offsets = [0, 13, 0, 0], sizes = [2, 1, 16, 12], strides = [1, 1, 1, 1]} : vector<2x16x16x12xf32> to vector<2x1x16x12xf32>
    %59 = arith.maximumf %57, %58 : vector<2x1x16x12xf32>
    %60 = vector.extract_strided_slice %8 {offsets = [0, 14, 0, 0], sizes = [2, 1, 16, 12], strides = [1, 1, 1, 1]} : vector<2x16x16x12xf32> to vector<2x1x16x12xf32>
    %61 = arith.maximumf %59, %60 : vector<2x1x16x12xf32>
    %62 = vector.extract_strided_slice %8 {offsets = [0, 15, 0, 0], sizes = [2, 1, 16, 12], strides = [1, 1, 1, 1]} : vector<2x16x16x12xf32> to vector<2x1x16x12xf32>
    %63 = arith.maximumf %61, %62 : vector<2x1x16x12xf32>
    %c0_17 = arith.constant 0 : index
    %c3 = arith.constant 3 : index
    %c0_18 = arith.constant 0 : index
    %c0_19 = arith.constant 0 : index
    %64 = vector.load %arg5[%c0_17, %c3, %c0_18, %c0_19] : memref<2x4x16x12xf32, #tpu.memory_space<vmem>>, vector<2x1x16x12xf32>
    tpu.vector_store %arg5[%c0_17, %c3, %c0_18, %c0_19], %63 {strides = array<i32>} : memref<2x4x16x12xf32, #tpu.memory_space<vmem>>, vector<2x1x16x12xf32>,
    %c0_20 = arith.constant 0 : index
    %c0_21 = arith.constant 0 : index
    %c0_22 = arith.constant 0 : index
    %c0_23 = arith.constant 0 : index
    %65 = vector.load %arg5[%c0_20, %c0_21, %c0_22, %c0_23] : memref<2x4x16x12xf32, #tpu.memory_space<vmem>>, vector<2x4x16x12xf32>
    %c15_i32 = arith.constant 15 : i32
    %66 = tpu.dynamic_rotate %65 by %c15_i32 dim 2 : vector<2x4x16x12xf32>, i32 -> vector<2x4x16x12xf32>
    %67 = arith.maximumf %65, %66 : vector<2x4x16x12xf32>
    %c14_i32 = arith.constant 14 : i32
    %68 = tpu.dynamic_rotate %65 by %c14_i32 dim 2 : vector<2x4x16x12xf32>, i32 -> vector<2x4x16x12xf32>
    %69 = arith.maximumf %67, %68 : vector<2x4x16x12xf32>
    %c13_i32 = arith.constant 13 : i32
    %70 = tpu.dynamic_rotate %65 by %c13_i32 dim 2 : vector<2x4x16x12xf32>, i32 -> vector<2x4x16x12xf32>
    %71 = arith.maximumf %69, %70 : vector<2x4x16x12xf32>
    %c12_i32 = arith.constant 12 : i32
    %72 = tpu.dynamic_rotate %65 by %c12_i32 dim 2 : vector<2x4x16x12xf32>, i32 -> vector<2x4x16x12xf32>
    %73 = arith.maximumf %71, %72 : vector<2x4x16x12xf32>
    %c11_i32 = arith.constant 11 : i32
    %74 = tpu.dynamic_rotate %65 by %c11_i32 dim 2 : vector<2x4x16x12xf32>, i32 -> vector<2x4x16x12xf32>
    %75 = arith.maximumf %73, %74 : vector<2x4x16x12xf32>
    %c10_i32 = arith.constant 10 : i32
    %76 = tpu.dynamic_rotate %65 by %c10_i32 dim 2 : vector<2x4x16x12xf32>, i32 -> vector<2x4x16x12xf32>
    %77 = arith.maximumf %75, %76 : vector<2x4x16x12xf32>
    %78 = vector.extract_strided_slice %77 {offsets = [0, 0, 0, 0], sizes = [2, 4, 1, 12], strides = [1, 1, 1, 1]} : vector<2x4x16x12xf32> to vector<2x4x1x12xf32>
    %c0_24 = arith.constant 0 : index
    %c0_25 = arith.constant 0 : index
    %c0_26 = arith.constant 0 : index
    %c0_27 = arith.constant 0 : index
    %79 = vector.load %arg4[%c0_24, %c0_25, %c0_26, %c0_27] : memref<2x4x4x12xf32, #tpu.memory_space<vmem>>, vector<2x4x1x12xf32>
    tpu.vector_store %arg4[%c0_24, %c0_25, %c0_26, %c0_27], %78 {strides = array<i32>} : memref<2x4x4x12xf32, #tpu.memory_space<vmem>>, vector<2x4x1x12xf32>,
    %80 = vector.extract_strided_slice %77 {offsets = [0, 0, 3, 0], sizes = [2, 4, 1, 12], strides = [1, 1, 1, 1]} : vector<2x4x16x12xf32> to vector<2x4x1x12xf32>
    %c0_28 = arith.constant 0 : index
    %c0_29 = arith.constant 0 : index
    %c1_30 = arith.constant 1 : index
    %c0_31 = arith.constant 0 : index
    %81 = vector.load %arg4[%c0_28, %c0_29, %c1_30, %c0_31] : memref<2x4x4x12xf32, #tpu.memory_space<vmem>>, vector<2x4x1x12xf32>
    tpu.vector_store %arg4[%c0_28, %c0_29, %c1_30, %c0_31], %80 {strides = array<i32>} : memref<2x4x4x12xf32, #tpu.memory_space<vmem>>, vector<2x4x1x12xf32>,
    %82 = vector.extract_strided_slice %77 {offsets = [0, 0, 6, 0], sizes = [2, 4, 1, 12], strides = [1, 1, 1, 1]} : vector<2x4x16x12xf32> to vector<2x4x1x12xf32>
    %c0_32 = arith.constant 0 : index
    %c0_33 = arith.constant 0 : index
    %c2_34 = arith.constant 2 : index
    %c0_35 = arith.constant 0 : index
    %83 = vector.load %arg4[%c0_32, %c0_33, %c2_34, %c0_35] : memref<2x4x4x12xf32, #tpu.memory_space<vmem>>, vector<2x4x1x12xf32>
    tpu.vector_store %arg4[%c0_32, %c0_33, %c2_34, %c0_35], %82 {strides = array<i32>} : memref<2x4x4x12xf32, #tpu.memory_space<vmem>>, vector<2x4x1x12xf32>,
    %84 = vector.extract_strided_slice %77 {offsets = [0, 0, 9, 0], sizes = [2, 4, 1, 12], strides = [1, 1, 1, 1]} : vector<2x4x16x12xf32> to vector<2x4x1x12xf32>
    %c0_36 = arith.constant 0 : index
    %c0_37 = arith.constant 0 : index
    %c3_38 = arith.constant 3 : index
    %c0_39 = arith.constant 0 : index
    %85 = vector.load %arg4[%c0_36, %c0_37, %c3_38, %c0_39] : memref<2x4x4x12xf32, #tpu.memory_space<vmem>>, vector<2x4x1x12xf32>
    tpu.vector_store %arg4[%c0_36, %c0_37, %c3_38, %c0_39], %84 {strides = array<i32>} : memref<2x4x4x12xf32, #tpu.memory_space<vmem>>, vector<2x4x1x12xf32>,
    return
  }
  func.func @transform_0(%arg0: i32) -> (i32, i32, i32, i32) {
    %c0_i32 = arith.constant 0 : i32
    %c0_i32_0 = arith.constant 0 : i32
    %c0_i32_1 = arith.constant 0 : i32
    %c0_i32_2 = arith.constant 0 : i32
    return %arg0, %c0_i32, %c0_i32_0, %c0_i32_1 : i32, i32, i32, i32
  }
  func.func @transform_1(%arg0: i32) -> (i32, i32) {
    %c0_i32 = arith.constant 0 : i32
    %c0_i32_0 = arith.constant 0 : i32
    %c0_i32_1 = arith.constant 0 : i32
    return %c0_i32, %c0_i32_0 : i32, i32
  }
  func.func @transform_2(%arg0: i32) -> (i32, i32) {
    %c0_i32 = arith.constant 0 : i32
    %c0_i32_0 = arith.constant 0 : i32
    %c0_i32_1 = arith.constant 0 : i32
    return %c0_i32, %c0_i32_0 : i32, i32
  }
  func.func @transform_3(%arg0: i32) -> (i32, i32, i32, i32) {
    %c0_i32 = arith.constant 0 : i32
    %c0_i32_0 = arith.constant 0 : i32
    %c0_i32_1 = arith.constant 0 : i32
    %c0_i32_2 = arith.constant 0 : i32
    return %arg0, %c0_i32, %c0_i32_0, %c0_i32_1 : i32, i32, i32, i32
  }
}

</mosaic_0001>

<bundles_post_ra>
// kernel: tpu_custom_call.1
= control target key start
LH: loop header
LB: loop body
LE: loop exit
PB: predicated region body
PF: predicated region fallthrough
CT: control target
= control target key end

     0   :  { %vm280_vm0 = vcmask 1042432   ;;  %vm87_vm1 = vcmask 23552   ;;  %s2587_s0 = inlined_call_operand.vmem [shape: f32[2,16,16,3], index: 0, kind: input, shape index: {}]   ;;  %s2588_s1 = inlined_call_operand.vmem [shape: f32[3,12], index: 1, kind: input, shape index: {}]   ;;  %s2589_s2 = inlined_call_operand.vmem [shape: f32[1,12], index: 2, kind: input, shape index: {}]   ;;  %s2590_s3 = inlined_call_operand.hbm [shape: f32[2,4,4,12], index: 3, kind: output, shape index: {}]  }
   0x1   :  { %v79_v0 = vld [vmem:[%s2588_s1] sm:$0x7]  ;;  %v16_v3 = vld [vmem:[%s2587_s0 + $0x8] sm:$0xff]  ;;  %v17_v5 = vld [vmem:[%s2587_s0 + $0x10] sm:$0xff] }
   0x2   :  { %v15_v1 = vld [vmem:[%s2587_s0] sm:$0xff]  ;;  %1344 = vmatprep.subr.msk.mxu0 %vm280_vm0, %v79_v0  ;;  %1442 = vmatprep.subr.msk.mxu1 %vm280_vm0, %v79_v0  ;;  %v48_v4 = vld [vmem:[%s2587_s0 + $0x108] sm:$0xff]  ;;  %v49_v6 = vld [vmem:[%s2587_s0 + $0x110] sm:$0xff] }
   0x3   :  { %v47_v2 = vld [vmem:[%s2587_s0 + $0x100] sm:$0xff]  ;;  %1345 = vmatpush3.msk.msra.mxu0 %vm280_vm0, %v79_v0  ;;  %1443 = vmatpush3.msk.msra.mxu1 %vm280_vm0, %v79_v0  ;;  %v18_v7 = vld [vmem:[%s2587_s0 + $0x18] sm:$0xff]  ;;  %v20_v11 = vld [vmem:[%s2587_s0 + $0x28] sm:$0xff] }
   0x4   :  { %1346 = vmatprep.mubr.msk.f32.mxu0 %vm87_vm1, %v15_v1  ;;  %1394 = vmatprep.mubr.msk.f32.mxu1 %vm87_vm1, %v47_v2  ;;  %v50_v8 = vld [vmem:[%s2587_s0 + $0x118] sm:$0xff]  ;;  %v19_v9 = vld [vmem:[%s2587_s0 + $0x20] sm:$0xff]  ;;  %v52_v12 = vld [vmem:[%s2587_s0 + $0x128] sm:$0xff] }
   0x5   :  { %1347 = vmatmul.mubr.msk.f32.vlgmr.msra.gmra.mrb[0].mxu0 %vm87_vm1, %v16_v3  ;;  %1395 = vmatmul.mubr.msk.f32.vlgmr.msra.gmra.mrb[0].mxu1 %vm87_vm1, %v48_v4  ;;  %v51_v10 = vld [vmem:[%s2587_s0 + $0x120] sm:$0xff]  ;;  %v21_v13 = vld [vmem:[%s2587_s0 + $0x30] sm:$0xff]  ;;  %v22_v15 = vld [vmem:[%s2587_s0 + $0x38] sm:$0xff] }
   0x6   :  { %1349 = vmatprep.mubr.msk.f32.mxu0 %vm87_vm1, %v17_v5  ;;  %1397 = vmatprep.mubr.msk.f32.mxu1 %vm87_vm1, %v49_v6  ;;  %v53_v14 = vld [vmem:[%s2587_s0 + $0x130] sm:$0xff]  ;;  %v54_v16 = vld [vmem:[%s2587_s0 + $0x138] sm:$0xff]  ;;  %v23_v17 = vld [vmem:[%s2587_s0 + $0x40] sm:$0xff] }
   0x7   :  { %v55_v18 = vld [vmem:[%s2587_s0 + $0x140] sm:$0xff]  ;;  %v24_v19 = vld [vmem:[%s2587_s0 + $0x48] sm:$0xff]  ;;  %v25_v21 = vld [vmem:[%s2587_s0 + $0x50] sm:$0xff] }
   0x8   :  { %v56_v20 = vld [vmem:[%s2587_s0 + $0x148] sm:$0xff]  ;;  %v57_v22 = vld [vmem:[%s2587_s0 + $0x150] sm:$0xff]  ;;  %v26_v23 = vld [vmem:[%s2587_s0 + $0x58] sm:$0xff] }
   0x9   :  { %1350 = vmatmul.mubr.msk.f32.gmra.mrb[2].mxu0 %vm87_vm1, %v18_v7  ;;  %1398 = vmatmul.mubr.msk.f32.gmra.mrb[2].mxu1 %vm87_vm1, %v50_v8  ;;  %v58_v24 = vld [vmem:[%s2587_s0 + $0x158] sm:$0xff] }
   0xa   :  { %1352 = vmatprep.mubr.msk.f32.mxu0 %vm87_vm1, %v19_v9  ;;  %1400 = vmatprep.mubr.msk.f32.mxu1 %vm87_vm1, %v51_v10 }
   0xd   :  { %1353 = vmatmul.mubr.msk.f32.gmra.mrb[4].mxu0 %vm87_vm1, %v20_v11  ;;  %1401 = vmatmul.mubr.msk.f32.gmra.mrb[4].mxu1 %vm87_vm1, %v52_v12 }
   0xe   :  { %1355 = vmatprep.mubr.msk.f32.mxu0 %vm87_vm1, %v21_v13  ;;  %1403 = vmatprep.mubr.msk.f32.mxu1 %vm87_vm1, %v53_v14 }
  0x11   :  { %1356 = vmatmul.mubr.msk.f32.gmra.mrb[6].mxu0 %vm87_vm1, %v22_v15  ;;  %1404 = vmatmul.mubr.msk.f32.gmra.mrb[6].mxu1 %vm87_vm1, %v54_v16 }
  0x12   :  { %1358 = vmatprep.mubr.msk.f32.mxu0 %vm87_vm1, %v23_v17  ;;  %1406 = vmatprep.mubr.msk.f32.mxu1 %vm87_vm1, %v55_v18 }
  0x15   :  { %1359 = vmatmul.mubr.msk.f32.gmra.mrb[8].mxu0 %vm87_vm1, %v24_v19  ;;  %1407 = vmatmul.mubr.msk.f32.gmra.mrb[8].mxu1 %vm87_vm1, %v56_v20 }
  0x16   :  { %1361 = vmatprep.mubr.msk.f32.mxu0 %vm87_vm1, %v25_v21  ;;  %1409 = vmatprep.mubr.msk.f32.mxu1 %vm87_vm1, %v57_v22 }
  0x17   :  { %8 = vsyncpa [#allocation4], 0  ;;  %v27_v25 = vld [vmem:[%s2587_s0 + $0x60] sm:$0xff]  ;;  %v28_v27 = vld [vmem:[%s2587_s0 + $0x68] sm:$0xff]  ;;  %vm757_vm2 = vcmask 97280   ;;  %vm1161_vm9 = vcmask 90112  }
  0x18   :  { %v59_v26 = vld [vmem:[%s2587_s0 + $0x160] sm:$0xff]  ;;  %v60_v28 = vld [vmem:[%s2587_s0 + $0x168] sm:$0xff]  ;;  %v29_v29 = vld [vmem:[%s2587_s0 + $0x70] sm:$0xff]  ;;  %vm1170_vm10 = vcmask 93187   ;;  %vm1179_vm11 = vcmask 96262   ;;  %vm1188_vm12 = vcmask 91137  }
  0x19   :  { %1362 = vmatmul.mubr.msk.f32.gmra.mrb[10].mxu0 %vm87_vm1, %v26_v23  ;;  %1410 = vmatmul.mubr.msk.f32.gmra.mrb[10].mxu1 %vm87_vm1, %v58_v24  ;;  %v61_v30 = vld [vmem:[%s2587_s0 + $0x170] sm:$0xff]  ;;  %v30_v31 = vld [vmem:[%s2587_s0 + $0x78] sm:$0xff]  ;;  %v31_v33 = vld [vmem:[%s2587_s0 + $0x80] sm:$0xff] }
  0x1a   :  { %1364 = vmatprep.mubr.msk.f32.mxu0 %vm87_vm1, %v27_v25  ;;  %1412 = vmatprep.mubr.msk.f32.mxu1 %vm87_vm1, %v59_v26  ;;  %v62_v32 = vld [vmem:[%s2587_s0 + $0x178] sm:$0xff]  ;;  %v63_v34 = vld [vmem:[%s2587_s0 + $0x180] sm:$0xff]  ;;  %v32_v35 = vld [vmem:[%s2587_s0 + $0x88] sm:$0xff] }
  0x1b   :  { %v64_v36 = vld [vmem:[%s2587_s0 + $0x188] sm:$0xff]  ;;  %v33_v37 = vld [vmem:[%s2587_s0 + $0x90] sm:$0xff]  ;;  %v34_v39 = vld [vmem:[%s2587_s0 + $0x98] sm:$0xff] }
  0x1c   :  { %v65_v38 = vld [vmem:[%s2587_s0 + $0x190] sm:$0xff]  ;;  %v66_v40 = vld [vmem:[%s2587_s0 + $0x198] sm:$0xff]  ;;  %v35_v41 = vld [vmem:[%s2587_s0 + $0xa0] sm:$0xff] }
  0x1d   :  { %1365 = vmatmul.mubr.msk.f32.gmra.mrb[12].mxu0 %vm87_vm1, %v28_v27  ;;  %1413 = vmatmul.mubr.msk.f32.gmra.mrb[12].mxu1 %vm87_vm1, %v60_v28  ;;  %v67_v42 = vld [vmem:[%s2587_s0 + $0x1a0] sm:$0xff]  ;;  %v36_v43 = vld [vmem:[%s2587_s0 + $0xa8] sm:$0xff]  ;;  %v37_v45 = vld [vmem:[%s2587_s0 + $0xb0] sm:$0xff] }
  0x1e   :  { %1367 = vmatprep.mubr.msk.f32.mxu0 %vm87_vm1, %v29_v29  ;;  %1415 = vmatprep.mubr.msk.f32.mxu1 %vm87_vm1, %v61_v30  ;;  %v68_v44 = vld [vmem:[%s2587_s0 + $0x1a8] sm:$0xff]  ;;  %v69_v46 = vld [vmem:[%s2587_s0 + $0x1b0] sm:$0xff]  ;;  %v38_v47 = vld [vmem:[%s2587_s0 + $0xb8] sm:$0xff] }
  0x1f   :  { %v70_v48 = vld [vmem:[%s2587_s0 + $0x1b8] sm:$0xff]  ;;  %v39_v49 = vld [vmem:[%s2587_s0 + $0xc0] sm:$0xff]  ;;  %v40_v51 = vld [vmem:[%s2587_s0 + $0xc8] sm:$0xff] }
  0x20   :  { %v71_v50 = vld [vmem:[%s2587_s0 + $0x1c0] sm:$0xff]  ;;  %v72_v52 = vld [vmem:[%s2587_s0 + $0x1c8] sm:$0xff]  ;;  %v41_v53 = vld [vmem:[%s2587_s0 + $0xd0] sm:$0xff] }
  0x21   :  { %1368 = vmatmul.mubr.msk.f32.gmra.mrb[14].mxu0 %vm87_vm1, %v30_v31  ;;  %1416 = vmatmul.mubr.msk.f32.gmra.mrb[14].mxu1 %vm87_vm1, %v62_v32  ;;  %v73_v54 = vld [vmem:[%s2587_s0 + $0x1d0] sm:$0xff]  ;;  %v42_v55 = vld [vmem:[%s2587_s0 + $0xd8] sm:$0xff]  ;;  %v43_v57 = vld [vmem:[%s2587_s0 + $0xe0] sm:$0xff] }
  0x22   :  { %1370 = vmatprep.mubr.msk.f32.mxu0 %vm87_vm1, %v31_v33  ;;  %1418 = vmatprep.mubr.msk.f32.mxu1 %vm87_vm1, %v63_v34  ;;  %v74_v56 = vld [vmem:[%s2587_s0 + $0x1d8] sm:$0xff]  ;;  %v75_v58 = vld [vmem:[%s2587_s0 + $0x1e0] sm:$0xff]  ;;  %v44_v59 = vld [vmem:[%s2587_s0 + $0xe8] sm:$0xff] }
  0x23   :  { %v76_v60 = vld [vmem:[%s2587_s0 + $0x1e8] sm:$0xff]  ;;  %v45_v61 = vld [vmem:[%s2587_s0 + $0xf0] sm:$0xff]  ;;  %v46_v63 = vld [vmem:[%s2587_s0 + $0xf8] sm:$0xff] }
  0x24   :  { %v77_v62 = vld [vmem:[%s2587_s0 + $0x1f0] sm:$0xff]  ;;  %v78_v0 = vld [vmem:[%s2587_s0 + $0x1f8] sm:$0xff]  ;;  %v1885_v1 = vld [vmem:[%s2589_s2] ss:$0 sm:$0xff] }
  0x25   :  { %1371 = vmatmul.mubr.msk.f32.gmra.mrb[16].mxu0 %vm87_vm1, %v32_v35  ;;  %1419 = vmatmul.mubr.msk.f32.gmra.mrb[16].mxu1 %vm87_vm1, %v64_v36 }
  0x26   :  { %1373 = vmatprep.mubr.msk.f32.mxu0 %vm87_vm1, %v33_v37  ;;  %1421 = vmatprep.mubr.msk.f32.mxu1 %vm87_vm1, %v65_v38 }
  0x29   :  { %1374 = vmatmul.mubr.msk.f32.gmra.mrb[18].mxu0 %vm87_vm1, %v34_v39  ;;  %1422 = vmatmul.mubr.msk.f32.gmra.mrb[18].mxu1 %vm87_vm1, %v66_v40 }
  0x2a   :  { %1376 = vmatprep.mubr.msk.f32.mxu0 %vm87_vm1, %v35_v41  ;;  %1424 = vmatprep.mubr.msk.f32.mxu1 %vm87_vm1, %v67_v42 }
  0x2d   :  { %1377 = vmatmul.mubr.msk.f32.gmra.mrb[20].mxu0 %vm87_vm1, %v36_v43  ;;  %1425 = vmatmul.mubr.msk.f32.gmra.mrb[20].mxu1 %vm87_vm1, %v68_v44 }
  0x2e   :  { %1379 = vmatprep.mubr.msk.f32.mxu0 %vm87_vm1, %v37_v45  ;;  %1427 = vmatprep.mubr.msk.f32.mxu1 %vm87_vm1, %v69_v46 }
  0x31   :  { %1380 = vmatmul.mubr.msk.f32.gmra.mrb[22].mxu0 %vm87_vm1, %v38_v47  ;;  %1428 = vmatmul.mubr.msk.f32.gmra.mrb[22].mxu1 %vm87_vm1, %v70_v48 }
  0x32   :  { %1382 = vmatprep.mubr.msk.f32.mxu0 %vm87_vm1, %v39_v49  ;;  %1430 = vmatprep.mubr.msk.f32.mxu1 %vm87_vm1, %v71_v50 }
  0x35   :  { %1383 = vmatmul.mubr.msk.f32.gmra.mrb[24].mxu0 %vm87_vm1, %v40_v51  ;;  %1431 = vmatmul.mubr.msk.f32.gmra.mrb[24].mxu1 %vm87_vm1, %v72_v52 }
  0x36   :  { %1385 = vmatprep.mubr.msk.f32.mxu0 %vm87_vm1, %v41_v53  ;;  %1433 = vmatprep.mubr.msk.f32.mxu1 %vm87_vm1, %v73_v54 }
  0x39   :  { %1386 = vmatmul.mubr.msk.f32.gmra.mrb[26].mxu0 %vm87_vm1, %v42_v55  ;;  %1434 = vmatmul.mubr.msk.f32.gmra.mrb[26].mxu1 %vm87_vm1, %v74_v56 }
  0x3a   :  { %1388 = vmatprep.mubr.msk.f32.mxu0 %vm87_vm1, %v43_v57  ;;  %1436 = vmatprep.mubr.msk.f32.mxu1 %vm87_vm1, %v75_v58 }
  0x3d   :  { %1389 = vmatmul.mubr.msk.f32.gmra.mrb[28].mxu0 %vm87_vm1, %v44_v59  ;;  %1437 = vmatmul.mubr.msk.f32.gmra.mrb[28].mxu1 %vm87_vm1, %v76_v60 }
  0x3e   :  { %1391 = vmatprep.mubr.msk.f32.mxu0 %vm87_vm1, %v45_v61  ;;  %1439 = vmatprep.mubr.msk.f32.mxu1 %vm87_vm1, %v77_v62 }
  0x41   :  { %1392 = vmatmul.mubr.msk.f32.gmra.mrb[30].mxu0 %vm87_vm1, %v46_v63  ;;  %1440 = vmatmul.mubr.msk.f32.gmra.mrb[30].mxu1 %vm87_vm1, %v78_v0 }
  0xd8   :  { %v1348_v2 = vpop.f32.mrb[0].mxu0  ;;  %v1396_v3 = vpop.f32.mrb[0].mxu1 }
  0xd9   :  { %v356_v4 = vadd.f32 %v1348_v2, %v1885_v1  ;;  %v516_v5 = vadd.f32 %v1396_v3, %v1885_v1  ;;  %v350_v6 = vpop.f32.mrb[1].mxu0  ;;  %v510_v7 = vpop.f32.mrb[1].mxu1 }
  0xda   :  { %v351_v8 = vadd.f32 %v1885_v1, %v350_v6  ;;  %v511_v9 = vadd.f32 %v1885_v1, %v510_v7 }
  0xdb   :  { %1447 = vtanh.f32 %v356_v4 }
  0xdc   :  { %1449 = vtanh.f32 %v516_v5  ;;  %v1351_v10 = vpop.f32.mrb[2].mxu0  ;;  %v1399_v11 = vpop.f32.mrb[2].mxu1 }
  0xdd   :  { %1451 = vtanh.f32 %v351_v8  ;;  %v366_v12 = vadd.f32 %v1351_v10, %v1885_v1  ;;  %v526_v13 = vadd.f32 %v1399_v11, %v1885_v1  ;;  %v360_v14 = vpop.f32.mrb[3].mxu0  ;;  %v520_v15 = vpop.f32.mrb[3].mxu1 }
  0xde   :  { %1453 = vtanh.f32 %v511_v9  ;;  %v361_v16 = vadd.f32 %v1885_v1, %v360_v14  ;;  %v521_v17 = vadd.f32 %v1885_v1, %v520_v15 }
  0xdf   :  { %1455 = vtanh.f32 %v366_v12 }
  0xe0   :  { %1457 = vtanh.f32 %v526_v13  ;;  %v1354_v18 = vpop.f32.mrb[4].mxu0  ;;  %v1402_v19 = vpop.f32.mrb[4].mxu1 }
  0xe1   :  { %1459 = vtanh.f32 %v361_v16  ;;  %v376_v20 = vadd.f32 %v1354_v18, %v1885_v1  ;;  %v536_v21 = vadd.f32 %v1402_v19, %v1885_v1  ;;  %v370_v22 = vpop.f32.mrb[5].mxu0  ;;  %v530_v23 = vpop.f32.mrb[5].mxu1 }
  0xe2   :  { %1461 = vtanh.f32 %v521_v17  ;;  %v371_v24 = vadd.f32 %v1885_v1, %v370_v22  ;;  %v531_v25 = vadd.f32 %v1885_v1, %v530_v23  ;;  %v881_v22 = vlaneseq }
  0xe3   :  { %1463 = vtanh.f32 %v376_v20 }
  0xe4   :  { %1465 = vtanh.f32 %v536_v21  ;;  %v1357_v26 = vpop.f32.mrb[6].mxu0  ;;  %v1405_v27 = vpop.f32.mrb[6].mxu1 }
  0xe5   :  { %v1448_v28 = vpop.eup %1447  ;;  %1467 = vtanh.f32 %v371_v24  ;;  %v386_v29 = vadd.f32 %v1357_v26, %v1885_v1  ;;  %v546_v30 = vadd.f32 %v1405_v27, %v1885_v1  ;;  %v380_v31 = vpop.f32.mrb[7].mxu0 }
  0xe6   :  { %v540_v32 = vpop.f32.mrb[7].mxu1  ;;  %v1450_v33 = vpop.eup %1449  ;;  %1469 = vtanh.f32 %v531_v25  ;;  %v381_v34 = vadd.f32 %v1885_v1, %v380_v31 }
  0xe7   :  { %v541_v35 = vadd.f32 %v1885_v1, %v540_v32  ;;  %v1452_v36 = vpop.eup %1451  ;;  %1471 = vtanh.f32 %v386_v29 }
  0xe8   :  { %v1454_v37 = vpop.eup %1453  ;;  %1473 = vtanh.f32 %v546_v30  ;;  %v1360_v38 = vpop.f32.mrb[8].mxu0 }
  0xe9   :  { %v1408_v39 = vpop.f32.mrb[8].mxu1  ;;  %v1456_v40 = vpop.eup %1455  ;;  %1475 = vtanh.f32 %v381_v34  ;;  %v396_v41 = vadd.f32 %v1360_v38, %v1885_v1 }
  0xea   :  { %v556_v42 = vadd.f32 %v1408_v39, %v1885_v1  ;;  %v390_v43 = vpop.f32.mrb[9].mxu0  ;;  %v550_v44 = vpop.f32.mrb[9].mxu1  ;;  %v734_v46 = vmax.f32 %v1448_v28, %v1456_v40  ;;  %1477 = vtanh.f32 %v541_v35 }
  0xeb   :  { %v1458_v45 = vpop.eup %1457  ;;  %v391_v47 = vadd.f32 %v1885_v1, %v390_v43  ;;  %v551_v48 = vadd.f32 %v1885_v1, %v550_v44  ;;  %1479 = vtanh.f32 %v396_v41 }
  0xec   :  { %v1460_v49 = vpop.eup %1459  ;;  %v736_v50 = vmax.f32 %v1450_v33, %v1458_v45  ;;  %1481 = vtanh.f32 %v556_v42  ;;  %v1363_v53 = vpop.f32.mrb[10].mxu0  ;;  %v1919_v42 = vshrl.u32 %v881_v22, 7 }
  0xed   :  { %v1462_v51 = vpop.eup %1461  ;;  %v733_v52 = vmax.f32 %v1452_v36, %v1460_v49  ;;  %v1411_v54 = vpop.f32.mrb[10].mxu1  ;;  %1483 = vtanh.f32 %v391_v47  ;;  %v406_v57 = vadd.f32 %v1363_v53, %v1885_v1 }
  0xee   :  { %v1464_v55 = vpop.eup %1463  ;;  %v735_v56 = vmax.f32 %v1454_v37, %v1462_v51  ;;  %v566_v58 = vadd.f32 %v1411_v54, %v1885_v1  ;;  %v400_v59 = vpop.f32.mrb[11].mxu0  ;;  %1485 = vtanh.f32 %v551_v48  ;;  %vm883_vm3 = vcmp.lt.s32.totalorder %v1919_v42, 7 }
  0xef   :  { %v560_v60 = vpop.f32.mrb[11].mxu1  ;;  %v1466_v61 = vpop.eup %1465  ;;  %v738_v62 = vmax.f32 %v734_v46, %v1464_v55  ;;  %v401_v63 = vadd.f32 %v1885_v1, %v400_v59  ;;  %1487 = vtanh.f32 %v406_v57  ;;  %vm932_vm4 = vcmp.lt.s32.totalorder %v1919_v42, 6 }
  0xf0   :  { %v561_v0 = vadd.f32 %v1885_v1, %v560_v60  ;;  %v1468_v2 = vpop.eup %1467  ;;  %v740_v3 = vmax.f32 %v736_v50, %v1466_v61  ;;  %1489 = vtanh.f32 %v566_v58  ;;  %v1366_v6 = vpop.f32.mrb[12].mxu0  ;;  %vm981_vm5 = vcmp.lt.s32.totalorder %v1919_v42, 5 }
  0xf1   :  { %v1470_v4 = vpop.eup %1469  ;;  %v737_v5 = vmax.f32 %v733_v52, %v1468_v2  ;;  %v1414_v7 = vpop.f32.mrb[12].mxu1  ;;  %1491 = vtanh.f32 %v401_v63  ;;  %v416_v10 = vadd.f32 %v1366_v6, %v1885_v1  ;;  %vm1030_vm6 = vcmp.lt.s32.totalorder %v1919_v42, 4 }
  0xf2   :  { %v1472_v8 = vpop.eup %1471  ;;  %v739_v9 = vmax.f32 %v735_v56, %v1470_v4  ;;  %v576_v11 = vadd.f32 %v1414_v7, %v1885_v1  ;;  %v410_v12 = vpop.f32.mrb[13].mxu0  ;;  %1493 = vtanh.f32 %v561_v0  ;;  %vm1079_vm7 = vcmp.lt.s32.totalorder %v1919_v42, 3 }
  0xf3   :  { %v570_v13 = vpop.f32.mrb[13].mxu1  ;;  %v1474_v14 = vpop.eup %1473  ;;  %v742_v15 = vmax.f32 %v738_v62, %v1472_v8  ;;  %v411_v16 = vadd.f32 %v1885_v1, %v410_v12  ;;  %1495 = vtanh.f32 %v416_v10  ;;  %vm1128_vm8 = vcmp.lt.s32.totalorder %v1919_v42, 2 }
  0xf4   :  { %v571_v17 = vadd.f32 %v1885_v1, %v570_v13  ;;  %v1476_v18 = vpop.eup %1475  ;;  %v744_v19 = vmax.f32 %v740_v3, %v1474_v14  ;;  %1497 = vtanh.f32 %v576_v11  ;;  %v1369_v23 = vpop.f32.mrb[14].mxu0 }
  0xf5   :  { %v1478_v20 = vpop.eup %1477  ;;  %v741_v21 = vmax.f32 %v737_v5, %v1476_v18  ;;  %v1417_v24 = vpop.f32.mrb[14].mxu1  ;;  %1499 = vtanh.f32 %v411_v16  ;;  %v426_v27 = vadd.f32 %v1369_v23, %v1885_v1 }
  0xf6   :  { %v1480_v25 = vpop.eup %1479  ;;  %v743_v26 = vmax.f32 %v739_v9, %v1478_v20  ;;  %v586_v28 = vadd.f32 %v1417_v24, %v1885_v1  ;;  %v420_v29 = vpop.f32.mrb[15].mxu0  ;;  %1501 = vtanh.f32 %v571_v17 }
  0xf7   :  { %v580_v30 = vpop.f32.mrb[15].mxu1  ;;  %v1482_v31 = vpop.eup %1481  ;;  %v746_v32 = vmax.f32 %v742_v15, %v1480_v25  ;;  %v763_v33 = vmax.f32 %v1472_v8, %v1480_v25  ;;  %v421_v34 = vadd.f32 %v1885_v1, %v420_v29  ;;  %1503 = vtanh.f32 %v426_v27 }
  0xf8   :  { %v1484_v35 = vpop.eup %1483  ;;  %v748_v36 = vmax.f32 %v744_v19, %v1482_v31  ;;  %v765_v37 = vmax.f32 %v1474_v14, %v1482_v31  ;;  %v581_v38 = vadd.f32 %v1885_v1, %v580_v30  ;;  %1505 = vtanh.f32 %v586_v28  ;;  %v1372_v43 = vpop.f32.mrb[16].mxu0 }
  0xf9   :  { %v1486_v39 = vpop.eup %1485  ;;  %v745_v40 = vmax.f32 %v741_v21, %v1484_v35  ;;  %v762_v41 = vmax.f32 %v1476_v18, %v1484_v35  ;;  %v1420_v44 = vpop.f32.mrb[16].mxu1  ;;  %1507 = vtanh.f32 %v421_v34  ;;  %v436_v48 = vadd.f32 %v1372_v43, %v1885_v1 }
  0xfa   :  { %v1488_v45 = vpop.eup %1487  ;;  %v747_v46 = vmax.f32 %v743_v26, %v1486_v39  ;;  %v764_v47 = vmax.f32 %v1478_v20, %v1486_v39  ;;  %v430_v49 = vpop.f32.mrb[17].mxu0  ;;  %1509 = vtanh.f32 %v581_v38  ;;  %v596_v54 = vadd.f32 %v1420_v44, %v1885_v1 }
  0xfb   :  { %v590_v50 = vpop.f32.mrb[17].mxu1  ;;  %v1490_v51 = vpop.eup %1489  ;;  %v750_v52 = vmax.f32 %v746_v32, %v1488_v45  ;;  %v767_v53 = vmax.f32 %v763_v33, %v1488_v45  ;;  %1511 = vtanh.f32 %v436_v48  ;;  %v431_v58 = vadd.f32 %v1885_v1, %v430_v49 }
  0xfc   :  { %v1492_v55 = vpop.eup %1491  ;;  %v752_v56 = vmax.f32 %v748_v36, %v1490_v51  ;;  %v769_v57 = vmax.f32 %v765_v37, %v1490_v51  ;;  %1513 = vtanh.f32 %v596_v54  ;;  %v591_v62 = vadd.f32 %v1885_v1, %v590_v50  ;;  %v1375_v63 = vpop.f32.mrb[18].mxu0 }
  0xfd   :  { %v1494_v59 = vpop.eup %1493  ;;  %v749_v60 = vmax.f32 %v745_v40, %v1492_v55  ;;  %v766_v61 = vmax.f32 %v762_v41, %v1492_v55  ;;  %v1423_v0 = vpop.f32.mrb[18].mxu1  ;;  %1515 = vtanh.f32 %v431_v58  ;;  %v446_v5 = vadd.f32 %v1375_v63, %v1885_v1 }
  0xfe   :  { %v1925_v2 = vpop.eup %1495  ;;  %v751_v3 = vmax.f32 %v747_v46, %v1494_v59  ;;  %v768_v4 = vmax.f32 %v764_v47, %v1494_v59  ;;  %v440_v6 = vpop.f32.mrb[19].mxu0  ;;  %1517 = vtanh.f32 %v591_v62  ;;  %v606_v11 = vadd.f32 %v1423_v0, %v1885_v1 }
  0xff   :  { %v600_v7 = vpop.f32.mrb[19].mxu1  ;;  %v1928_v8 = vpop.eup %1497  ;;  %v754_v9 = vmax.f32 %v750_v52, %v1925_v2  ;;  %v771_v10 = vmax.f32 %v767_v53, %v1925_v2  ;;  %1519 = vtanh.f32 %v446_v5  ;;  %v441_v15 = vadd.f32 %v1885_v1, %v440_v6 }
 0x100   :  { %v1933_v12 = vpop.eup %1499  ;;  %v756_v13 = vmax.f32 %v752_v56, %v1928_v8  ;;  %v773_v14 = vmax.f32 %v769_v57, %v1928_v8  ;;  %1521 = vtanh.f32 %v606_v11  ;;  %v601_v19 = vadd.f32 %v1885_v1, %v600_v7  ;;  %v1378_v20 = vpop.f32.mrb[20].mxu0 }
 0x101   :  { %v1938_v16 = vpop.eup %1501  ;;  %759 = vst.msk [vmem:[#allocation2 + $0x8] sm:$0xff] %vm757_vm2, %v754_v9  ;;  %v753_v17 = vmax.f32 %v749_v60, %v1933_v12  ;;  %v770_v18 = vmax.f32 %v766_v61, %v1933_v12  ;;  %v1426_v21 = vpop.f32.mrb[20].mxu1  ;;  %1523 = vtanh.f32 %v441_v15  ;;  %v456_v25 = vadd.f32 %v1378_v20, %v1885_v1 }
 0x102   :  { %v1504_v22 = vpop.eup %1503  ;;  %761 = vst.msk [vmem:[#allocation2 + $0x48] sm:$0xff] %vm757_vm2, %v756_v13  ;;  %v755_v23 = vmax.f32 %v751_v3, %v1938_v16  ;;  %v772_v24 = vmax.f32 %v768_v4, %v1938_v16  ;;  %v450_v26 = vpop.f32.mrb[21].mxu0  ;;  %1525 = vtanh.f32 %v601_v19  ;;  %v616_v31 = vadd.f32 %v1426_v21, %v1885_v1 }
 0x103   :  { %v610_v27 = vpop.f32.mrb[21].mxu1  ;;  %v1506_v28 = vpop.eup %1505  ;;  %758 = vst.msk [vmem:[#allocation2] sm:$0xff] %vm757_vm2, %v753_v17  ;;  %v1951_v29 = vmax.f32 %v771_v10, %v1504_v22  ;;  %v792_v30 = vmax.f32 %v1925_v2, %v1504_v22  ;;  %1527 = vtanh.f32 %v456_v25  ;;  %v451_v35 = vadd.f32 %v1885_v1, %v450_v26 }
 0x104   :  { %v1955_v32 = vpop.eup %1507  ;;  %760 = vst.msk [vmem:[#allocation2 + $0x40] sm:$0xff] %vm757_vm2, %v755_v23  ;;  %v1959_v33 = vmax.f32 %v773_v14, %v1506_v28  ;;  %v794_v34 = vmax.f32 %v1928_v8, %v1506_v28  ;;  %1529 = vtanh.f32 %v616_v31  ;;  %v611_v39 = vadd.f32 %v1885_v1, %v610_v27  ;;  %v1381_v40 = vpop.f32.mrb[22].mxu0 }
 0x105   :  { %v1963_v36 = vpop.eup %1509  ;;  %v1968_v37 = vmax.f32 %v770_v18, %v1955_v32  ;;  %v1429_v41 = vpop.f32.mrb[22].mxu1  ;;  %1531 = vtanh.f32 %v451_v35  ;;  %v466_v46 = vadd.f32 %v1381_v40, %v1885_v1 }
 0x106   :  { %v1973_v43 = vpop.eup %1511  ;;  %v1976_v44 = vmax.f32 %v772_v24, %v1963_v36  ;;  %v1981_v47 = vpop.f32.mrb[23].mxu0  ;;  %1533 = vtanh.f32 %v611_v39  ;;  %v2003_v56 = vadd.f32 %v1429_v41, %v1885_v1 }
 0x107   :  { %v1983_v48 = vpop.f32.mrb[23].mxu1  ;;  %v1985_v49 = vpop.eup %1513  ;;  %v1991_v51 = vmax.f32 %v792_v30, %v1973_v43  ;;  %1535 = vtanh.f32 %v466_v46 }
 0x108   :  { %v1993_v52 = vpop.eup %1515  ;;  %v1995_v53 = vld [vmem:[#allocation2 + $0x8] sm:$0xff]  ;;  %v2000_v55 = vmax.f32 %v794_v34, %v1985_v49  ;;  %v2013_v63 = vpop.f32.mrb[24].mxu0  ;;  %1537 = vtanh.f32 %v2003_v56 }
 0x109   :  { %v2005_v57 = vpop.eup %1517  ;;  %v873_v58 = vrot.slane %v1995_v53, 1  ;;  %v924_v59 = vrot.slane %v1995_v53, 2  ;;  %v973_v60 = vrot.slane %v1995_v53, 3  ;;  %v1022_v61 = vrot.slane %v1995_v53, 4  ;;  %v2011_v62 = vld [vmem:[#allocation2 + $0x48] sm:$0xff]  ;;  %v2021_v7 = vpop.f32.mrb[24].mxu1 }
 0x10a   :  { %v2015_v0 = vpop.eup %1519  ;;  %v1071_v2 = vrot.slane %v1995_v53, 5  ;;  %v1120_v3 = vrot.slane %v1995_v53, 6  ;;  %v877_v4 = vrot.slane %v2011_v62, 1  ;;  %v928_v5 = vrot.slane %v2011_v62, 2  ;;  %v849_v6 = vld [vmem:[#allocation2] sm:$0xff]  ;;  %v2031_v15 = vpop.f32.mrb[25].mxu0 }
 0x10b   :  { %v2023_v8 = vpop.eup %1521  ;;  %v2029_v14 = vld [vmem:[#allocation2 + $0x40] sm:$0xff]  ;;  %v865_v18 = vrot.slane %v849_v6, 1  ;;  %v916_v19 = vrot.slane %v849_v6, 2  ;;  %v965_v20 = vrot.slane %v849_v6, 3  ;;  %v1014_v21 = vrot.slane %v849_v6, 4  ;;  %v2035_v22 = vpop.f32.mrb[25].mxu1 }
 0x10c   :  { %v2033_v17 = vpop.eup %1523  ;;  %v1063_v24 = vrot.slane %v849_v6, 5  ;;  %v1112_v25 = vrot.slane %v849_v6, 6  ;;  %v869_v26 = vrot.slane %v2029_v14, 1  ;;  %v920_v27 = vrot.slane %v2029_v14, 2  ;;  %v2041_v28 = vpop.f32.mrb[26].mxu0 }
 0x10d   :  { %v2037_v23 = vpop.eup %1525  ;;  %v2043_v30 = vpop.f32.mrb[26].mxu1  ;;  %v884_v34 = vsel %vm883_vm3, %v865_v18, %v873_v58  ;;  %v892_v35 = vsel %vm883_vm3, %v873_v58, %v865_v18  ;;  %v933_v39 = vsel %vm932_vm4, %v916_v19, %v924_v59  ;;  %v941_v40 = vsel %vm932_vm4, %v924_v59, %v916_v19 }
 0x10e   :  { %v2045_v31 = vpop.eup %1527  ;;  %v2055_v41 = vpop.f32.mrb[27].mxu0  ;;  %v900_v50 = vmax.f32 %v849_v6, %v884_v34  ;;  %v901_v45 = vmax.f32 %v1995_v53, %v892_v35  ;;  %v982_v38 = vsel %vm981_vm5, %v965_v20, %v973_v60  ;;  %v990_v58 = vsel %vm981_vm5, %v973_v60, %v965_v20 }
 0x10f   :  { %2591 = vst [vmem:[#allocation6_spill] sm:$0xff] %v2055_v41  ;;  %v2057_v46 = vpop.f32.mrb[27].mxu1  ;;  %v2059_v54 = vpop.eup %1529  ;;  %v1031_v59 = vsel %vm1030_vm6, %v1014_v21, %v1022_v61  ;;  %v1039_v19 = vsel %vm1030_vm6, %v1022_v61, %v1014_v21  ;;  %v1080_v13 = vsel %vm1079_vm7, %v1063_v24, %v1071_v2  ;;  %v1088_v53 = vsel %vm1079_vm7, %v1071_v2, %v1063_v24 }
 0x110   :  { %2592 = vst [vmem:[#allocation7_spill] sm:$0xff] %v2057_v46  ;;  %v2066_v18 = vpop.eup %1531  ;;  %v949_v60 = vmax.f32 %v900_v50, %v933_v39  ;;  %v950_v20 = vmax.f32 %v901_v45, %v941_v40  ;;  %v1129_v34 = vsel %vm1128_vm8, %v1112_v25, %v1120_v3  ;;  %v1137_v61 = vsel %vm1128_vm8, %v1120_v3, %v1112_v25  ;;  %v2082_v21 = vpop.f32.mrb[28].mxu0 }
 0x111   :  { %v2076_v6 = vpop.eup %1533  ;;  %2593 = vst [vmem:[#allocation8_spill] sm:$0xff] %v2082_v21  ;;  %v2084_v35 = vpop.f32.mrb[28].mxu1  ;;  %v888_v2 = vsel %vm883_vm3, %v869_v26, %v877_v4  ;;  %v896_v24 = vsel %vm883_vm3, %v877_v4, %v869_v26  ;;  %v937_v45 = vsel %vm932_vm4, %v920_v27, %v928_v5  ;;  %v945_v50 = vsel %vm932_vm4, %v928_v5, %v920_v27 }
 0x112   :  { %2594 = vst [vmem:[#allocation9_spill] sm:$0xff] %v2084_v35  ;;  %v2086_v11 = vpop.eup %1535  ;;  %v2096_v39 = vpop.f32.mrb[29].mxu0  ;;  %v998_v25 = vmax.f32 %v949_v60, %v982_v38  ;;  %v999_v40 = vmax.f32 %v950_v20, %v990_v58  ;;  %v908_v10 = vmax.f32 %v2029_v14, %v888_v2  ;;  %v909_v9 = vmax.f32 %v2011_v62, %v896_v24 }
 0x113   :  { %2595 = vst [vmem:[#allocation10_spill] sm:$0xff] %v2096_v39  ;;  %v2098_v3 = vpop.f32.mrb[29].mxu1  ;;  %v969_v35 = vrot.slane %v2029_v14, 3  ;;  %v1018_v4 = vrot.slane %v2029_v14, 4  ;;  %v1067_v26 = vrot.slane %v2029_v14, 5  ;;  %v1116_v21 = vrot.slane %v2029_v14, 6 }
 0x114   :  { %v1047_v46 = vmax.f32 %v998_v25, %v1031_v59  ;;  %v1048_v5 = vmax.f32 %v999_v40, %v1039_v19  ;;  %v957_v27 = vmax.f32 %v908_v10, %v937_v45  ;;  %v958_v39 = vmax.f32 %v909_v9, %v945_v50  ;;  %v2106_v41 = vpop.f32.mrb[30].mxu0  ;;  %v2108_v38 = vpop.f32.mrb[30].mxu1 }
 0x115   :  { %v2596_v58 = vrot.slane %v2011_v62, 3  ;;  %v2598_v14 = vrot.slane %v2011_v62, 4  ;;  %v2126_v19 = vpop.f32.mrb[31].mxu0  ;;  %v2128_v24 = vpop.f32.mrb[31].mxu1  ;;  %v2236_v56 = vadd.f32 %v2041_v28, %v1885_v1 }
 0x116   :  { %v1096_v45 = vmax.f32 %v1047_v46, %v1080_v13  ;;  %v1097_v50 = vmax.f32 %v1048_v5, %v1088_v53 }
 0x117   :  { %v986_v60 = vsel %vm981_vm5, %v969_v35, %v2596_v58  ;;  %v2597_v20 = vmov %v2596_v58  ;;  %v1035_v10 = vsel %vm1030_vm6, %v1018_v4, %v2598_v14  ;;  %v2599_v9 = vmov %v2598_v14 }
 0x118   :  { %v994_v2 = vsel %vm981_vm5, %v2597_v20, %v969_v35  ;;  %v1043_v59 = vsel %vm1030_vm6, %v2599_v9, %v1018_v4  ;;  %v1006_v25 = vmax.f32 %v957_v27, %v986_v60  ;;  %v2600_v35 = vrot.slane %v2011_v62, 5 }
 0x119   :  { %v1007_v40 = vmax.f32 %v958_v39, %v994_v2  ;;  %v2602_v4 = vrot.slane %v2011_v62, 6  ;;  %v1145_v53 = vmax.f32 %v1096_v45, %v1129_v34  ;;  %v1146_v39 = vmax.f32 %v1097_v50, %v1137_v61 }
 0x11a   :  { %v1084_v58 = vsel %vm1079_vm7, %v1067_v26, %v2600_v35  ;;  %v2601_v20 = vmov %v2600_v35  ;;  %v1055_v5 = vmax.f32 %v1006_v25, %v1035_v10  ;;  %v778_v60 = vmax.f32 %v1968_v37, %v1993_v52 }
 0x11b   :  { %v1092_v14 = vsel %vm1079_vm7, %v2601_v20, %v1067_v26  ;;  %v1133_v9 = vsel %vm1128_vm8, %v1116_v21, %v2602_v4  ;;  %v2603_v13 = vmov %v2602_v4  ;;  %v1056_v27 = vmax.f32 %v1007_v40, %v1043_v59  ;;  %1162 = vst.msk [vmem:[#allocation3] sm:$0x1] %vm1161_vm9, %v1145_v53 }
 0x11c   :  { %v1141_v46 = vsel %vm1128_vm8, %v2603_v13, %v1116_v21  ;;  %v2604_v26 = vmax.f32 %v1933_v12, %v1955_v32  ;;  %v780_v35 = vmax.f32 %v1976_v44, %v2005_v57  ;;  %v2605_v62 = vmax.f32 %v1938_v16, %v1963_v36  ;;  %1171 = vst.msk [vmem:[#allocation3 - $0x2] sm:$0x8] %vm1170_vm10, %v1145_v53 }
 0x11d   :  { %1180 = vst.msk [vmem:[#allocation3 - $0x4] sm:$0x40] %vm1179_vm11, %v1145_v53  ;;  %v1104_v37 = vmax.f32 %v1055_v5, %v1084_v58  ;;  %v1105_v34 = vmax.f32 %v1056_v27, %v1092_v14  ;;  %v2606_v12 = vmax.f32 %v1951_v29, %v1973_v43  ;;  %v2607_v16 = vmax.f32 %v1959_v33, %v1985_v49 }
 0x11e   :  { %v795_v2 = vmax.f32 %v2604_v26, %v1993_v52  ;;  %v797_v21 = vmax.f32 %v2605_v62, %v2005_v57  ;;  %1189 = vst.msk [vmem:[#allocation3 + $0x2] sm:$0x2] %vm1188_vm12, %v1146_v39  ;;  %v782_v44 = vmax.f32 %v778_v60, %v2033_v17  ;;  %v784_v52 = vmax.f32 %v780_v35, %v2037_v23 }
 0x11f   :  { %v783_v32 = vmax.f32 %v2606_v12, %v2015_v0  ;;  %v785_v36 = vmax.f32 %v2607_v16, %v2023_v8  ;;  %v800_v57 = vmax.f32 %v1991_v51, %v2015_v0  ;;  %v821_v61 = vmax.f32 %v2015_v0, %v2045_v31 }
 0x120   :  { %v1153_v10 = vmax.f32 %v1104_v37, %v1133_v9  ;;  %v1154_v59 = vmax.f32 %v1105_v34, %v1141_v46  ;;  %v802_v29 = vmax.f32 %v2000_v55, %v2023_v8  ;;  %v823_v33 = vmax.f32 %v2023_v8, %v2059_v54  ;;  %787 = vst.msk [vmem:[#allocation2 + $0x10] sm:$0xff] %vm757_vm2, %v782_v44 }
 0x121   :  { %788 = vst.msk [vmem:[#allocation2 + $0x18] sm:$0xff] %vm757_vm2, %v783_v32  ;;  %790 = vst.msk [vmem:[#allocation2 + $0x58] sm:$0xff] %vm757_vm2, %v785_v36  ;;  %v2185_v43 = vmax.f32 %v800_v57, %v2045_v31  ;;  %v799_v49 = vmax.f32 %v795_v2, %v2033_v17  ;;  %v820_v51 = vmax.f32 %v2033_v17, %v2066_v18 }
 0x122   :  { %789 = vst.msk [vmem:[#allocation2 + $0x50] sm:$0xff] %vm757_vm2, %v784_v52  ;;  %v801_v0 = vmax.f32 %v797_v21, %v2037_v23  ;;  %v2196_v55 = vmax.f32 %v802_v29, %v2059_v54  ;;  %v2201_v45 = vmax.f32 %v821_v61, %v2086_v11  ;;  %v461_v50 = vadd.f32 %v1885_v1, %v1981_v47 }
 0x123   :  { %1166 = vst.msk [vmem:[#allocation3 + $0x10] sm:$0x1] %vm1161_vm9, %v1153_v10  ;;  %v2206_v25 = vmax.f32 %v799_v49, %v2066_v18  ;;  %v621_v20 = vadd.f32 %v1885_v1, %v1983_v48  ;;  %v476_v14 = vadd.f32 %v2013_v63, %v1885_v1  ;;  %v2220_v47 = vadd.f32 %v2021_v7, %v1885_v1  ;;  %v2269_v49 = vpop.eup %1537 }
 0x124   :  { %1175 = vst.msk [vmem:[#allocation3 + $0xe] sm:$0x8] %vm1170_vm10, %v1153_v10  ;;  %v2209_v40 = vmax.f32 %v801_v0, %v2076_v6  ;;  %1539 = vtanh.f32 %v461_v50  ;;  %v2224_v4 = vadd.f32 %v1885_v1, %v2031_v15  ;;  %v2232_v48 = vadd.f32 %v1885_v1, %v2035_v22 }
 0x125   :  { %1184 = vst.msk [vmem:[#allocation3 + $0xc] sm:$0x40] %vm1179_vm11, %v1153_v10  ;;  %1541 = vtanh.f32 %v621_v20  ;;  %v2240_v63 = vadd.f32 %v2043_v30, %v1885_v1  ;;  %v2608_v8 = vmax.f32 %v2037_v23, %v2076_v6  ;;  %v2609_v18 = vmax.f32 %v2185_v43, %v2086_v11  ;;  %v2610_v23 = vld [vmem:[#allocation6_spill] sm:$0xff]  ;;  %v2612_v43 = vld [vmem:[#allocation8_spill] sm:$0xff] }
 0x126   :  { %1193 = vst.msk [vmem:[#allocation3 + $0x12] sm:$0x2] %vm1188_vm12, %v1154_v59  ;;  %1543 = vtanh.f32 %v476_v14  ;;  %v481_v6 = vadd.f32 %v1885_v1, %v2610_v23 }
 0x127   :  { %v851_v53 = vld [vmem:[#allocation2 + $0x10] sm:$0xff]  ;;  %1545 = vtanh.f32 %v2220_v47  ;;  %v2613_v47 = vld [vmem:[#allocation9_spill] sm:$0xff] }
 0x128   :  { %v2226_v9 = vld [vmem:[#allocation2 + $0x18] sm:$0xff]  ;;  %v866_v35 = vrot.slane %v851_v53, 1  ;;  %v917_v62 = vrot.slane %v851_v53, 2  ;;  %v966_v21 = vrot.slane %v851_v53, 3  ;;  %v1015_v37 = vrot.slane %v851_v53, 4 }
 0x129   :  { %v2228_v13 = vld [vmem:[#allocation2 + $0x58] sm:$0xff]  ;;  %v874_v7 = vrot.slane %v2226_v9, 1  ;;  %v925_v15 = vrot.slane %v2226_v9, 2  ;;  %v974_v46 = vrot.slane %v2226_v9, 3  ;;  %v1023_v39 = vrot.slane %v2226_v9, 4  ;;  %v2249_v27 = vld [vmem:[#allocation2 + $0x50] sm:$0xff] }
 0x12a   :  { %v1072_v22 = vrot.slane %v2226_v9, 5  ;;  %v1121_v5 = vrot.slane %v2226_v9, 6  ;;  %v878_v28 = vrot.slane %v2228_v13, 1  ;;  %v929_v30 = vrot.slane %v2228_v13, 2 }
 0x12b   :  { %v978_v60 = vrot.slane %v2228_v13, 3  ;;  %v1027_v26 = vrot.slane %v2228_v13, 4  ;;  %v1076_v2 = vrot.slane %v2228_v13, 5  ;;  %v1125_v34 = vrot.slane %v2228_v13, 6 }
 0x12c   :  { %v1064_v12 = vrot.slane %v851_v53, 5  ;;  %v1113_v32 = vrot.slane %v851_v53, 6  ;;  %v870_v16 = vrot.slane %v2249_v27, 1  ;;  %v885_v36 = vsel %vm883_vm3, %v866_v35, %v874_v7 }
 0x12d   :  { %v893_v44 = vsel %vm883_vm3, %v874_v7, %v866_v35  ;;  %v934_v52 = vsel %vm932_vm4, %v917_v62, %v925_v15  ;;  %v921_v57 = vrot.slane %v2249_v27, 2  ;;  %v902_v61 = vmax.f32 %v851_v53, %v885_v36 }
 0x12e   :  { %v903_v10 = vmax.f32 %v2226_v9, %v893_v44  ;;  %v942_v59 = vsel %vm932_vm4, %v925_v15, %v917_v62  ;;  %v983_v29 = vsel %vm981_vm5, %v966_v21, %v974_v46  ;;  %v991_v0 = vsel %vm981_vm5, %v974_v46, %v966_v21  ;;  %v2279_v9 = vpop.eup %1539 }
 0x12f   :  { %v1032_v50 = vsel %vm1030_vm6, %v1015_v37, %v1023_v39  ;;  %v1040_v20 = vsel %vm1030_vm6, %v1023_v39, %v1015_v37  ;;  %v1081_v14 = vsel %vm1079_vm7, %v1064_v12, %v1072_v22  ;;  %v951_v7 = vmax.f32 %v902_v61, %v934_v52  ;;  %v2285_v46 = vpop.eup %1541 }
 0x130   :  { %v952_v15 = vmax.f32 %v903_v10, %v942_v59  ;;  %v1089_v53 = vsel %vm1079_vm7, %v1072_v22, %v1064_v12  ;;  %v1130_v35 = vsel %vm1128_vm8, %v1113_v32, %v1121_v5  ;;  %v889_v62 = vsel %vm883_vm3, %v870_v16, %v878_v28  ;;  %v2295_v36 = vpop.eup %1543 }
 0x131   :  { %v897_v39 = vsel %vm883_vm3, %v878_v28, %v870_v16  ;;  %v938_v21 = vsel %vm932_vm4, %v921_v57, %v929_v30  ;;  %v946_v37 = vsel %vm932_vm4, %v929_v30, %v921_v57  ;;  %v1000_v22 = vmax.f32 %v951_v7, %v983_v29 }
 0x132   :  { %v1001_v12 = vmax.f32 %v952_v15, %v991_v0  ;;  %v910_v44 = vmax.f32 %v2249_v27, %v889_v62  ;;  %v911_v52 = vmax.f32 %v2228_v13, %v897_v39  ;;  %v970_v61 = vrot.slane %v2249_v27, 3  ;;  %v2611_v13 = vld [vmem:[#allocation7_spill] sm:$0xff] }
 0x133   :  { %v1019_v10 = vrot.slane %v2249_v27, 4  ;;  %v1068_v28 = vrot.slane %v2249_v27, 5  ;;  %v1117_v16 = vrot.slane %v2249_v27, 6  ;;  %v1049_v59 = vmax.f32 %v1000_v22, %v1032_v50 }
 0x134   :  { %v1050_v58 = vmax.f32 %v1001_v12, %v1040_v20  ;;  %v959_v31 = vmax.f32 %v910_v44, %v938_v21  ;;  %v960_v30 = vmax.f32 %v911_v52, %v946_v37  ;;  %v1138_v57 = vsel %vm1128_vm8, %v1121_v5, %v1113_v32 }
 0x135   :  { %v987_v29 = vsel %vm981_vm5, %v970_v61, %v978_v60  ;;  %v995_v0 = vsel %vm981_vm5, %v978_v60, %v970_v61  ;;  %v1036_v7 = vsel %vm1030_vm6, %v1019_v10, %v1027_v26  ;;  %v1098_v15 = vmax.f32 %v1049_v59, %v1081_v14 }
 0x136   :  { %v1099_v62 = vmax.f32 %v1050_v58, %v1089_v53  ;;  %v1008_v39 = vmax.f32 %v959_v31, %v987_v29  ;;  %v1009_v27 = vmax.f32 %v960_v30, %v995_v0  ;;  %v1044_v50 = vsel %vm1030_vm6, %v1027_v26, %v1019_v10 }
 0x137   :  { %v1085_v20 = vsel %vm1079_vm7, %v1068_v28, %v1076_v2  ;;  %v1093_v5 = vsel %vm1079_vm7, %v1076_v2, %v1068_v28  ;;  %v1134_v60 = vsel %vm1128_vm8, %v1117_v16, %v1125_v34  ;;  %v1147_v32 = vmax.f32 %v1098_v15, %v1130_v35 }
 0x138   :  { %v1148_v21 = vmax.f32 %v1099_v62, %v1138_v57  ;;  %v1057_v14 = vmax.f32 %v1008_v39, %v1036_v7  ;;  %v1058_v58 = vmax.f32 %v1009_v27, %v1044_v50  ;;  %v810_v31 = vmax.f32 %v2196_v55, %v2269_v49 }
 0x139   :  { %v827_v26 = vmax.f32 %v823_v33, %v2269_v49  ;;  %v807_v2 = vmax.f32 %v2206_v25, %v2279_v9  ;;  %v824_v53 = vmax.f32 %v820_v51, %v2279_v9  ;;  %1163 = vst.msk [vmem:[#allocation3 + $0x4] sm:$0x1] %vm1161_vm9, %v1147_v32  ;;  %v809_v54 = vmax.f32 %v2209_v40, %v2285_v46  ;;  %v1546_v9 = vpop.eup %1545 }
 0x13a   :  { %1172 = vst.msk [vmem:[#allocation3 + $0x2] sm:$0x8] %vm1170_vm10, %v1147_v32  ;;  %v1106_v55 = vmax.f32 %v1057_v14, %v1085_v20  ;;  %v1107_v35 = vmax.f32 %v1058_v58, %v1093_v5  ;;  %v826_v33 = vmax.f32 %v2608_v8, %v2285_v46  ;;  %v1142_v17 = vsel %vm1128_vm8, %v1125_v34, %v1117_v16  ;;  %v1575_v16 = vld [vmem:[%s2589_s2] ss:$0 sm:$0xff]  ;;  %s1600_s2 = smov [#allocation3]  }
 0x13b   :  { %1181 = vst.msk [vmem:[#allocation3] sm:$0x40] %vm1179_vm11, %v1147_v32  ;;  %v812_v51 = vmax.f32 %v2609_v18, %v2295_v36  ;;  %v829_v25 = vmax.f32 %v2201_v45, %v2295_v36  ;;  %1547 = vtanh.f32 %v2224_v4  ;;  %v641_v11 = vadd.f32 %v1885_v1, %v2611_v13  ;;  %s1202_s5 = sshll.u32 %s1600_s2, 4  ;;  %s1203_s5 = int_to_ptr.vmem [resolvable:$true] %s1202_s5 }
 0x13c   :  { %1190 = vst.msk [vmem:[#allocation3 + $0x6] sm:$0x2] %vm1188_vm12, %v1148_v21  ;;  %v1155_v40 = vmax.f32 %v1106_v55, %v1134_v60  ;;  %v1156_v49 = vmax.f32 %v1107_v35, %v1142_v17  ;;  %1549 = vtanh.f32 %v2232_v48  ;;  %v496_v45 = vadd.f32 %v2612_v43, %v1885_v1  ;;  %v2614_v48 = vld [vmem:[#allocation10_spill] sm:$0xff]  ;;  %s1576_s6 = scalar_lea.vmem %s1203_s5, 512  ;;  %p1581_p1 = scmp.lt.s32.totalorder %s1203_s5, %s1203_s5 }
 0x13d   :  { %817 = vst.msk [vmem:[#allocation2 + $0x28] sm:$0xff] %vm757_vm2, %v812_v51  ;;  %1551 = vtanh.f32 %v2236_v56  ;;  %v656_v4 = vadd.f32 %v2613_v47, %v1885_v1  ;;  %v491_v34 = vadd.f32 %v1885_v1, %v2614_v48  ;;  %v814_v37 = vmax.f32 %v810_v31, %v1546_v9  ;;  %p1577_p0 = scmp.ne.s32.totalorder %s1203_s5, %s1576_s6  ;;  %p1582_p2 = scmp.lt.s32.totalorder %s1576_s6, %s1576_s6 }
 0x13e   :  { %1167 = vst.msk [vmem:[#allocation3 + $0x14] sm:$0x1] %vm1161_vm9, %v1155_v40  ;;  %1553 = vtanh.f32 %v2240_v63  ;;  %v831_v56 = vmax.f32 %v827_v26, %v1546_v9  ;;  %v651_v61 = vadd.f32 %v1885_v1, %v2098_v3  ;;  %v506_v59 = vadd.f32 %v1575_v16, %v2106_v41 }
 0x13f   :  { %1176 = vst.msk [vmem:[#allocation3 + $0x12] sm:$0x8] %vm1170_vm10, %v1155_v40  ;;  %1555 = vtanh.f32 %v481_v6  ;;  %v666_v29 = vadd.f32 %v1575_v16, %v2108_v38  ;;  %v501_v7 = vadd.f32 %v1575_v16, %v2126_v19  ;;  %v661_v41 = vadd.f32 %v1575_v16, %v2128_v24  ;;  %p1583_p3 = por %p1582_p2, %p1581_p1 }
 0x140   :  { %1185 = vst.msk [vmem:[#allocation3 + $0x10] sm:$0x40] %vm1179_vm11, %v1155_v40  ;;  %1557 = vtanh.f32 %v641_v11 }
 0x141   :  { %1194 = vst.msk [vmem:[#allocation3 + $0x16] sm:$0x2] %vm1188_vm12, %v1156_v49  ;;  %1559 = vtanh.f32 %v496_v45  ;;  %p1584_p4 = pnand %p1583_p3, %p1577_p0 }
 0x142   :  { %1561 = vtanh.f32 %v656_v4  ;;  %819 = vst.msk [vmem:[#allocation2 + $0x68] sm:$0xff] %vm757_vm2, %v814_v37 }
 0x143   :  { %1563 = vtanh.f32 %v491_v34 }
 0x144   :  { %v854_v1 = vld [vmem:[#allocation2 + $0x28] sm:$0xff]  ;;  %1565 = vtanh.f32 %v651_v61 }
 0x145   :  { %v1548_v46 = vpop.eup %1547  ;;  %1567 = vtanh.f32 %v506_v59  ;;  %v875_v50 = vrot.slane %v854_v1, 1  ;;  %v926_v19 = vrot.slane %v854_v1, 2  ;;  %v975_v5 = vrot.slane %v854_v1, 3 }
 0x146   :  { %v1550_v36 = vpop.eup %1549  ;;  %v811_v22 = vmax.f32 %v807_v2, %v1548_v46  ;;  %v828_v12 = vmax.f32 %v824_v53, %v1548_v46  ;;  %1569 = vtanh.f32 %v666_v29  ;;  %v1024_v32 = vrot.slane %v854_v1, 4 }
 0x147   :  { %v1552_v44 = vpop.eup %1551  ;;  %v813_v63 = vmax.f32 %v809_v54, %v1550_v36  ;;  %v830_v52 = vmax.f32 %v826_v33, %v1550_v36  ;;  %1571 = vtanh.f32 %v501_v7  ;;  %v1073_v21 = vrot.slane %v854_v1, 5 }
 0x148   :  { %v1554_v10 = vpop.eup %1553  ;;  %816 = vst.msk [vmem:[#allocation2 + $0x20] sm:$0xff] %vm757_vm2, %v811_v22  ;;  %v2377_v28 = vmax.f32 %v829_v25, %v1552_v44  ;;  %v1122_v14 = vrot.slane %v854_v1, 6  ;;  %1573 = vtanh.f32 %v661_v41 }
 0x149   :  { %v1556_v30 = vpop.eup %1555  ;;  %818 = vst.msk [vmem:[#allocation2 + $0x60] sm:$0xff] %vm757_vm2, %v813_v63  ;;  %v2384_v57 = vmax.f32 %v831_v56, %v1554_v10  ;;  %v2403_v60 = vld [vmem:[#allocation2 + $0x68] sm:$0xff] }
 0x14a   :  { %v1558_v0 = vpop.eup %1557  ;;  %v2387_v3 = vmax.f32 %v828_v12, %v1556_v30  ;;  %v879_v31 = vrot.slane %v2403_v60, 1  ;;  %v930_v26 = vrot.slane %v2403_v60, 2  ;;  %v979_v55 = vrot.slane %v2403_v60, 3 }
 0x14b   :  { %v2390_v15 = vpop.eup %1559  ;;  %v2392_v62 = vmax.f32 %v830_v52, %v1558_v0  ;;  %v1028_v35 = vrot.slane %v2403_v60, 4  ;;  %v1077_v33 = vrot.slane %v2403_v60, 5  ;;  %v1126_v25 = vrot.slane %v2403_v60, 6 }
 0x14c   :  { %v2395_v39 = vpop.eup %1561  ;;  %v837_v27 = vmax.f32 %v2377_v28, %v2390_v15 }
 0x14d   :  { %v2399_v38 = vpop.eup %1563  ;;  %v839_v20 = vmax.f32 %v2384_v57, %v2395_v39 }
 0x14e   :  { %v836_v24 = vmax.f32 %v2387_v3, %v2399_v38  ;;  %v1566_v47 = vpop.eup %1565 }
 0x14f   :  { %v853_v58 = vld [vmem:[#allocation2 + $0x20] sm:$0xff]  ;;  %v1568_v46 = vpop.eup %1567 }
 0x150   :  { %v867_v2 = vrot.slane %v853_v58, 1  ;;  %v918_v53 = vrot.slane %v853_v58, 2  ;;  %v967_v54 = vrot.slane %v853_v58, 3  ;;  %v1016_v8 = vrot.slane %v853_v58, 4  ;;  %v2417_v6 = vld [vmem:[#allocation2 + $0x60] sm:$0xff]  ;;  %v1570_v12 = vpop.eup %1569 }
 0x151   :  { %v1065_v51 = vrot.slane %v853_v58, 5  ;;  %v1114_v23 = vrot.slane %v853_v58, 6  ;;  %v871_v36 = vrot.slane %v2417_v6, 1  ;;  %v922_v22 = vrot.slane %v2417_v6, 2  ;;  %v1572_v10 = vpop.eup %1571 }
 0x152   :  { %v886_v17 = vsel %vm883_vm3, %v867_v2, %v875_v50  ;;  %v894_v18 = vsel %vm883_vm3, %v875_v50, %v867_v2  ;;  %v935_v13 = vsel %vm932_vm4, %v918_v53, %v926_v19  ;;  %v943_v11 = vsel %vm932_vm4, %v926_v19, %v918_v53  ;;  %v1574_v0 = vpop.eup %1573 }
 0x153   :  { %v904_v40 = vmax.f32 %v853_v58, %v886_v17  ;;  %v905_v49 = vmax.f32 %v854_v1, %v894_v18  ;;  %v984_v43 = vsel %vm981_vm5, %v967_v54, %v975_v5  ;;  %v992_v45 = vsel %vm981_vm5, %v975_v5, %v967_v54 }
 0x154   :  { %v1033_v34 = vsel %vm1030_vm6, %v1016_v8, %v1024_v32  ;;  %v1041_v9 = vsel %vm1030_vm6, %v1024_v32, %v1016_v8  ;;  %v1082_v37 = vsel %vm1079_vm7, %v1065_v51, %v1073_v21  ;;  %v1090_v56 = vsel %vm1079_vm7, %v1073_v21, %v1065_v51 }
 0x155   :  { %v953_v4 = vmax.f32 %v904_v40, %v935_v13  ;;  %v954_v48 = vmax.f32 %v905_v49, %v943_v11  ;;  %v1131_v52 = vsel %vm1128_vm8, %v1114_v23, %v1122_v14  ;;  %v1139_v61 = vsel %vm1128_vm8, %v1122_v14, %v1114_v23 }
 0x156   :  { %v890_v16 = vsel %vm883_vm3, %v871_v36, %v879_v31  ;;  %v898_v59 = vsel %vm883_vm3, %v879_v31, %v871_v36  ;;  %v971_v30 = vrot.slane %v2417_v6, 3  ;;  %v1020_v29 = vrot.slane %v2417_v6, 4 }
 0x157   :  { %v1002_v44 = vmax.f32 %v953_v4, %v984_v43  ;;  %v1003_v63 = vmax.f32 %v954_v48, %v992_v45  ;;  %v912_v41 = vmax.f32 %v2417_v6, %v890_v16  ;;  %v913_v50 = vmax.f32 %v2403_v60, %v898_v59 }
 0x158   :  { %v939_v19 = vsel %vm932_vm4, %v922_v22, %v930_v26  ;;  %v947_v5 = vsel %vm932_vm4, %v930_v26, %v922_v22  ;;  %v1069_v32 = vrot.slane %v2417_v6, 5  ;;  %v1118_v21 = vrot.slane %v2417_v6, 6 }
 0x159   :  { %v1051_v1 = vmax.f32 %v1002_v44, %v1033_v34  ;;  %v1052_v7 = vmax.f32 %v1003_v63, %v1041_v9  ;;  %v961_v31 = vmax.f32 %v912_v41, %v939_v19  ;;  %v962_v2 = vmax.f32 %v913_v50, %v947_v5 }
 0x15a   :  { %v988_v53 = vsel %vm981_vm5, %v971_v30, %v979_v55  ;;  %v996_v54 = vsel %vm981_vm5, %v979_v55, %v971_v30  ;;  %v1037_v8 = vsel %vm1030_vm6, %v1020_v29, %v1028_v35  ;;  %v1045_v26 = vsel %vm1030_vm6, %v1028_v35, %v1020_v29 }
 0x15b   :  { %v1100_v14 = vmax.f32 %v1051_v1, %v1082_v37  ;;  %v1101_v58 = vmax.f32 %v1052_v7, %v1090_v56  ;;  %v1010_v51 = vmax.f32 %v961_v31, %v988_v53  ;;  %v1011_v40 = vmax.f32 %v962_v2, %v996_v54 }
 0x15c   :  { %v838_v49 = vmax.f32 %v2392_v62, %v1566_v47  ;;  %v841_v23 = vmax.f32 %v837_v27, %v1568_v46  ;;  %v843_v55 = vmax.f32 %v839_v20, %v1570_v12  ;;  %v840_v6 = vmax.f32 %v836_v24, %v1572_v10 }
 0x15d   :  { %v1149_v17 = vmax.f32 %v1100_v14, %v1131_v52  ;;  %v1150_v18 = vmax.f32 %v1101_v58, %v1139_v61  ;;  %v1059_v62 = vmax.f32 %v1010_v51, %v1037_v8  ;;  %v1060_v35 = vmax.f32 %v1011_v40, %v1045_v26 }
 0x15e   :  { %v1086_v28 = vsel %vm1079_vm7, %v1069_v32, %v1077_v33  ;;  %v1094_v57 = vsel %vm1079_vm7, %v1077_v33, %v1069_v32  ;;  %846 = vst.msk [vmem:[#allocation2 + $0x38] sm:$0xff] %vm757_vm2, %v841_v23  ;;  %848 = vst.msk [vmem:[#allocation2 + $0x78] sm:$0xff] %vm757_vm2, %v843_v55  ;;  %v842_v3 = vmax.f32 %v838_v49, %v1574_v0 }
 0x15f   :  { %1164 = vst.msk [vmem:[#allocation3 + $0x8] sm:$0x1] %vm1161_vm9, %v1149_v17  ;;  %v1108_v15 = vmax.f32 %v1059_v62, %v1086_v28  ;;  %v1109_v39 = vmax.f32 %v1060_v35, %v1094_v57  ;;  %v1135_v27 = vsel %vm1128_vm8, %v1118_v21, %v1126_v25  ;;  %v1143_v38 = vsel %vm1128_vm8, %v1126_v25, %v1118_v21 }
 0x160   :  { %1173 = vst.msk [vmem:[#allocation3 + $0x6] sm:$0x8] %vm1170_vm10, %v1149_v17 }
 0x161   :  { %1182 = vst.msk [vmem:[#allocation3 + $0x4] sm:$0x40] %vm1179_vm11, %v1149_v17  ;;  %v1157_v20 = vmax.f32 %v1108_v15, %v1135_v27  ;;  %v1158_v24 = vmax.f32 %v1109_v39, %v1143_v38 }
 0x162   :  { %1191 = vst.msk [vmem:[#allocation3 + $0xa] sm:$0x2] %vm1188_vm12, %v1150_v18 }
 0x163   :  { %845 = vst.msk [vmem:[#allocation2 + $0x30] sm:$0xff] %vm757_vm2, %v840_v6  ;;  %847 = vst.msk [vmem:[#allocation2 + $0x70] sm:$0xff] %vm757_vm2, %v842_v3 }
 0x164   :  { %1168 = vst.msk [vmem:[#allocation3 + $0x18] sm:$0x1] %vm1161_vm9, %v1157_v20 }
 0x165   :  { %1177 = vst.msk [vmem:[#allocation3 + $0x16] sm:$0x8] %vm1170_vm10, %v1157_v20  ;;  %v856_v33 = vld [vmem:[#allocation2 + $0x38] sm:$0xff] }
 0x166   :  { %1186 = vst.msk [vmem:[#allocation3 + $0x14] sm:$0x40] %vm1179_vm11, %v1157_v20  ;;  %v2501_v13 = vld [vmem:[#allocation2 + $0x78] sm:$0xff]  ;;  %v876_v60 = vrot.slane %v856_v33, 1  ;;  %v927_v43 = vrot.slane %v856_v33, 2  ;;  %v976_v45 = vrot.slane %v856_v33, 3 }
 0x167   :  { %1195 = vst.msk [vmem:[#allocation3 + $0x1a] sm:$0x2] %vm1188_vm12, %v1158_v24  ;;  %v1025_v25 = vrot.slane %v856_v33, 4  ;;  %v1074_v47 = vrot.slane %v856_v33, 5  ;;  %v1123_v4 = vrot.slane %v856_v33, 6  ;;  %v880_v48 = vrot.slane %v2501_v13, 1 }
 0x168   :  { %v931_v34 = vrot.slane %v2501_v13, 2  ;;  %v980_v46 = vrot.slane %v2501_v13, 3  ;;  %v1029_v22 = vrot.slane %v2501_v13, 4  ;;  %v1078_v12 = vrot.slane %v2501_v13, 5 }
 0x169   :  { %v1127_v44 = vrot.slane %v2501_v13, 6 }
 0x16a   :  { %v855_v11 = vld [vmem:[#allocation2 + $0x30] sm:$0xff] }
 0x16b   :  { %v2505_v9 = vld [vmem:[#allocation2 + $0x70] sm:$0xff]  ;;  %v868_v37 = vrot.slane %v855_v11, 1  ;;  %v919_v56 = vrot.slane %v855_v11, 2  ;;  %v968_v36 = vrot.slane %v855_v11, 3  ;;  %v1017_v63 = vrot.slane %v855_v11, 4 }
 0x16c   :  { %v1066_v10 = vrot.slane %v855_v11, 5  ;;  %v872_v16 = vrot.slane %v2505_v9, 1  ;;  %v1115_v29 = vrot.slane %v855_v11, 6  ;;  %v923_v0 = vrot.slane %v2505_v9, 2 }
 0x16d   :  { %v887_v52 = vsel %vm883_vm3, %v868_v37, %v876_v60  ;;  %v895_v61 = vsel %vm883_vm3, %v876_v60, %v868_v37  ;;  %v936_v1 = vsel %vm932_vm4, %v919_v56, %v927_v43  ;;  %v944_v7 = vsel %vm932_vm4, %v927_v43, %v919_v56 }
 0x16e   :  { %v906_v59 = vmax.f32 %v855_v11, %v887_v52  ;;  %v907_v30 = vmax.f32 %v856_v33, %v895_v61  ;;  %v985_v41 = vsel %vm981_vm5, %v968_v36, %v976_v45  ;;  %v993_v50 = vsel %vm981_vm5, %v976_v45, %v968_v36 }
 0x16f   :  { %v1034_v32 = vsel %vm1030_vm6, %v1017_v63, %v1025_v25  ;;  %v1042_v21 = vsel %vm1030_vm6, %v1025_v25, %v1017_v63  ;;  %v1083_v14 = vsel %vm1079_vm7, %v1066_v10, %v1074_v47  ;;  %v1091_v58 = vsel %vm1079_vm7, %v1074_v47, %v1066_v10 }
 0x170   :  { %v955_v19 = vmax.f32 %v906_v59, %v936_v1  ;;  %v956_v5 = vmax.f32 %v907_v30, %v944_v7  ;;  %v891_v31 = vsel %vm883_vm3, %v872_v16, %v880_v48  ;;  %v899_v2 = vsel %vm883_vm3, %v880_v48, %v872_v16 }
 0x171   :  { %v914_v8 = vmax.f32 %v2505_v9, %v891_v31  ;;  %v915_v26 = vmax.f32 %v2501_v13, %v899_v2  ;;  %v940_v17 = vsel %vm932_vm4, %v923_v0, %v931_v34  ;;  %v948_v18 = vsel %vm932_vm4, %v931_v34, %v923_v0 }
 0x172   :  { %v1004_v53 = vmax.f32 %v955_v19, %v985_v41  ;;  %v1005_v54 = vmax.f32 %v956_v5, %v993_v50  ;;  %v972_v51 = vrot.slane %v2505_v9, 3  ;;  %v1021_v40 = vrot.slane %v2505_v9, 4 }
 0x173   :  { %v963_v55 = vmax.f32 %v914_v8, %v940_v17  ;;  %v964_v6 = vmax.f32 %v915_v26, %v948_v18  ;;  %v1132_v62 = vsel %vm1128_vm8, %v1115_v29, %v1123_v4  ;;  %v1070_v57 = vrot.slane %v2505_v9, 5 }
 0x174   :  { %v1053_v49 = vmax.f32 %v1004_v53, %v1034_v32  ;;  %v1054_v23 = vmax.f32 %v1005_v54, %v1042_v21  ;;  %v989_v35 = vsel %vm981_vm5, %v972_v51, %v980_v46  ;;  %v997_v28 = vsel %vm981_vm5, %v980_v46, %v972_v51 }
 0x175   :  { %v1012_v39 = vmax.f32 %v963_v55, %v989_v35  ;;  %v1013_v27 = vmax.f32 %v964_v6, %v997_v28  ;;  %v1140_v38 = vsel %vm1128_vm8, %v1123_v4, %v1115_v29  ;;  %v1038_v20 = vsel %vm1030_vm6, %v1021_v40, %v1029_v22 }
 0x176   :  { %v1102_v3 = vmax.f32 %v1053_v49, %v1083_v14  ;;  %v1103_v15 = vmax.f32 %v1054_v23, %v1091_v58  ;;  %v1046_v24 = vsel %vm1030_vm6, %v1029_v22, %v1021_v40  ;;  %v1119_v33 = vrot.slane %v2505_v9, 6 }
 0x177   :  { %v1061_v60 = vmax.f32 %v1012_v39, %v1038_v20  ;;  %v1062_v43 = vmax.f32 %v1013_v27, %v1046_v24  ;;  %v1087_v45 = vsel %vm1079_vm7, %v1070_v57, %v1078_v12  ;;  %v1095_v25 = vsel %vm1079_vm7, %v1078_v12, %v1070_v57 }
 0x178   :  { %v1151_v13 = vmax.f32 %v1102_v3, %v1132_v62  ;;  %v1152_v11 = vmax.f32 %v1103_v15, %v1140_v38  ;;  %v1136_v48 = vsel %vm1128_vm8, %v1119_v33, %v1127_v44  ;;  %v1144_v34 = vsel %vm1128_vm8, %v1127_v44, %v1119_v33 }
 0x179   :  { %v1110_v47 = vmax.f32 %v1061_v60, %v1087_v45  ;;  %v1111_v4 = vmax.f32 %v1062_v43, %v1095_v25 }
 0x17a   :  { %1165 = vst.msk [vmem:[#allocation3 + $0xc] sm:$0x1] %vm1161_vm9, %v1151_v13 }
 0x17b   :  { %1174 = vst.msk [vmem:[#allocation3 + $0xa] sm:$0x8] %vm1170_vm10, %v1151_v13  ;;  %v1159_v9 = vmax.f32 %v1110_v47, %v1136_v48  ;;  %v1160_v46 = vmax.f32 %v1111_v4, %v1144_v34 }
 0x17c   :  { %1183 = vst.msk [vmem:[#allocation3 + $0x8] sm:$0x40] %vm1179_vm11, %v1151_v13 }
 0x17d   :  { %1192 = vst.msk [vmem:[#allocation3 + $0xe] sm:$0x2] %vm1188_vm12, %v1152_v11  ;;  %1196 = vst.msk [vmem:[#allocation3 + $0x1e] sm:$0x2] %vm1188_vm12, %v1160_v46 }
 0x17e   :  { %1169 = vst.msk [vmem:[#allocation3 + $0x1c] sm:$0x1] %vm1161_vm9, %v1159_v9 }
 0x17f   :  { %1178 = vst.msk [vmem:[#allocation3 + $0x1a] sm:$0x8] %vm1170_vm10, %v1159_v9 }
 0x180   :  { %1187 = vst.msk [vmem:[#allocation3 + $0x18] sm:$0x40] %vm1179_vm11, %v1159_v9 }
 0x181   :  { %1587 = shalt.err (!%p1584_p4)
}
 0x182   :  { %s1588_s9 = scalar_lea.hbm %s2590_s3, 512 }
 0x183   :  { %p1589_p5 = scmp.ne.s32.totalorder %s2590_s3, %s1588_s9  ;;  %p1592_p6 = scmp.lt.u32.totalorder %s1588_s9, %s2590_s3 }
 0x185   :  { %p1594_p7 = pnand %p1592_p6, %p1589_p5 }
 0x187   :  { %1597 = shalt.err (!%p1594_p7)
}
 0x188   :  { %s1601_s14 = smov 64   ;;  %s1602_s15 = smov 4  }
 0x189   :  { %1208 = dma.vmem_to_hbm [thread:$0]  %s1203_s5, 512, %s2590_s3, [#allocation4], %s1601_s14, %s1601_s14, %s1602_s15  }
 0x18a   :  { %1598 = dma.done.wait [#allocation4], 512  }
 0x18b   :  { %1599 = vsyncadd [#allocation4], 4294966784 }
 0x18c   :  { %1212 = vsyncpa [#allocation4], 1 }

</bundles_post_ra>
